<compile_context>
chip_gen: v5e
topology: v5e:2x2
jax: 0.10.0
libtpu: 0.0.40
codegen_flags: <defaults>
</compile_context>

<pallas_src>
import functools
from dataclasses import dataclass
from typing import Any, Callable, Dict, Optional

import numpy as np

import jax
import jax.numpy as jnp
from jax.experimental import pallas as pl
from jax.experimental.pallas import tpu as pltpu


# ----------------------------------------------------------------------------
# Fused kernel: row-im2col conv GEMM + bias/ReLU + folded policy/value GEMM,
# single lane-dense output slab.
# ----------------------------------------------------------------------------
def fused_game_model_kernel(xrow_ref, wconv_ref, bconv_ref, whead_ref, bpv_ref,
                            out_ref, *, num_actions):
    # xrow_ref : (TILE_B, H+2, (W+2)*Cin)  spatially padded input, f32,
    #            width and channels pre-merged on the lane axis.
    # wconv_ref: (3*(W+2)*Cin, W*Chid)     banded row-conv weights, bf16.
    # bconv_ref: (1, W*Chid)               conv bias tiled over x, f32.
    # whead_ref: (H*W*Chid, A_pad)         policy weights with the value weight
    #                                      in column `num_actions`, rows
    #                                      permuted to the kernel's flatten
    #                                      order (y, x, c), zero-padded to a
    #                                      128-multiple of columns, bf16.
    # bpv_ref  : (1, A_pad)                [policy bias | value bias | 0], f32.
    # out_ref  : (TILE_B, A_pad)           [policy | tanh(value) | 0], f32.
    tile_b, h_pad, wcin = xrow_ref.shape          # wcin = (W+2)*Cin
    H = h_pad - 2
    WCh = wconv_ref.shape[1]                      # W*Chid (lane-dense, 128-mult)

    xr = xrow_ref[...]

    # --- conv as ONE im2col GEMM over image rows (K = 3*(W+2)*Cin) ----------
    # Concatenate the 3 vertically shifted row windows along the lane axis once.
    patches = jnp.concatenate(
        [xr[:, dy:dy + H, :].reshape(tile_b * H, wcin) for dy in range(3)],
        axis=-1)                                          # (TILE_B*H, 3*wcin)
    h = jnp.dot(patches.astype(jnp.bfloat16), wconv_ref[...],
                preferred_element_type=jnp.float32)       # (TILE_B*H, W*Chid)
    h = jnp.maximum(h + bconv_ref[...], 0.0)              # bias + ReLU in f32

    # --- flatten to (TILE_B, F) entirely in VMEM ----------------------------
    # Rows of h are (b, y); per-y slabs are 128-aligned (W*Chid = 256 lanes),
    # so this is a lane-tile concatenation, no HBM traffic, no transpose.
    h3 = h.reshape(tile_b, H, WCh)
    hflat = jnp.concatenate(
        [h3[:, y:y + 1, :].reshape(tile_b, WCh) for y in range(H)],
        axis=-1)                                          # (TILE_B, H*W*Chid)

    # --- fused policy + value head: one (B, F) @ (F, A_pad) MXU GEMM --------
    pv = jnp.dot(hflat.astype(jnp.bfloat16), whead_ref[...],
                 preferred_element_type=jnp.float32)      # (TILE_B, A_pad)
    pv = pv + bpv_ref[...]

    # tanh only on the value lane (EUP), then one unmasked lane-dense store.
    lane = jax.lax.broadcasted_iota(jnp.int32, pv.shape, 1)
    out_ref[...] = jnp.where(lane == num_actions, jnp.tanh(pv),
                             pv).astype(out_ref.dtype)


# ----------------------------------------------------------------------------
# Offline parameter preparation (free at runtime):
#  * banded row-conv weight matrix,
#  * conv bias tiled over x,
#  * policy/value weights permuted to the kernel's flatten order, fused into
#    one (F, A_pad) matrix (value in column A, zero pad to 128-multiple),
#    pre-cast to bf16 for the MXU.
# ----------------------------------------------------------------------------
def prepare_params(w_conv, b_conv, wp, bp, wv, bv, H, W):
    Chid, Cin, KH, KW = w_conv.shape              # OIHW, 3x3 conv
    assert KH == 3 and KW == 3
    Wp2 = W + 2
    A = wp.shape[1]
    A_pad = ((A + 1 + 127) // 128) * 128          # lane-dense output width

    w_np = np.asarray(w_conv, np.float32)
    # Banded weight: output column (x, co) reads rows (dy, x+dx, ci).
    w_row = np.zeros((KH * Wp2 * Cin, W * Chid), np.float32)
    for x in range(W):
        for dy in range(KH):
            for dx in range(KW):
                for ci in range(Cin):
                    r = dy * Wp2 * Cin + (x + dx) * Cin + ci
                    w_row[r, x * Chid:(x + 1) * Chid] = w_np[:, ci, dy, dx]
    b_row = np.tile(np.asarray(b_conv, np.float32), W)[None, :]   # (1, W*Chid)

    # Head weights: torch flatten order is f = co*H*W + y*W + x (NCHW);
    # the kernel's flatten order is y*W*Chid + x*Chid + co  -> permute rows.
    wp_np = np.asarray(wp, np.float32).reshape(Chid, H, W, A)
    wv_np = np.asarray(wv, np.float32).reshape(Chid, H, W)
    wp_perm = wp_np.transpose(1, 2, 0, 3).reshape(H * W * Chid, A)
    wv_perm = wv_np.transpose(1, 2, 0).reshape(H * W * Chid)

    w_heads = np.zeros((H * W * Chid, A_pad), np.float32)
    w_heads[:, :A] = wp_perm
    w_heads[:, A] = wv_perm
    b_heads = np.zeros((1, A_pad), np.float32)
    b_heads[0, :A] = np.asarray(bp, np.float32)
    b_heads[0, A] = float(np.asarray(bv, np.float32))

    return {
        'w_conv_row': jnp.asarray(w_row, jnp.bfloat16),
        'b_conv_row': jnp.asarray(b_row, jnp.float32),
        'w_heads': jnp.asarray(w_heads, jnp.bfloat16),
        'b_heads': jnp.asarray(b_heads, jnp.float32),
    }


# ----------------------------------------------------------------------------
# Forward pass: minimal XLA glue (transpose/pad/reshape of the tiny input),
# then one fused pallas_call over a parallel batch grid.
# ----------------------------------------------------------------------------
def _base_forward(params, x_nchw, *, num_actions):
    B, Cin, H, W = x_nchw.shape
    x_nhwc = jnp.transpose(x_nchw, (0, 2, 3, 1))
    xp = jnp.pad(x_nhwc, ((0, 0), (1, 1), (1, 1), (0, 0)))
    xrow = xp.reshape(B, H + 2, (W + 2) * Cin)

    A_pad = params['w_heads'].shape[-1]
    tile_b = 8 if B % 8 == 0 else B               # sublane-aligned batch tile
    grid_b = B // tile_b

    out = pl.pallas_call(
        functools.partial(fused_game_model_kernel, num_actions=num_actions),
        out_shape=jax.ShapeDtypeStruct((B, A_pad), jnp.float32),
        grid=(grid_b,),
        in_specs=[
            pl.BlockSpec((tile_b, H + 2, (W + 2) * Cin), lambda i: (i, 0, 0)),
            pl.BlockSpec(params['w_conv_row'].shape, lambda i: (0, 0)),
            pl.BlockSpec(params['b_conv_row'].shape, lambda i: (0, 0)),
            pl.BlockSpec(params['w_heads'].shape, lambda i: (0, 0)),
            pl.BlockSpec(params['b_heads'].shape, lambda i: (0, 0)),
        ],
        out_specs=pl.BlockSpec((tile_b, A_pad), lambda i: (i, 0)),
        # Batch axis is independent -> shard across TensorCores on v7x.
        # Per-step working set (input tile + weights, double-buffered) is
        # well under the default scoped VMEM on every generation.
        compiler_params=pltpu.CompilerParams(
            dimension_semantics=("parallel",)),
    )(xrow, params['w_conv_row'], params['b_conv_row'],
      params['w_heads'], params['b_heads'])

    policy = out[:, :num_actions]
    value = out[:, num_actions:num_actions + 1]
    return policy, value


# ----------------------------------------------------------------------------
# Base game model (Pallas-backed) + AdapterWrapper equivalent
# ----------------------------------------------------------------------------
@dataclass
class ModelMetadata:
    architecture: str
    input_channels: int
    board_height: int
    board_width: int
    num_actions: int
    model_params: Dict[str, Any]
    training_config: Optional[Dict[str, Any]] = None
    performance_stats: Optional[Dict[str, Any]] = None
    # TODO(synk): ModelMetadata JSON save/load is file I/O, not kernel work.


class PallasBaseGameModel:
    """conv3x3+ReLU -> flatten(NCHW) -> policy Linear / value Linear+tanh."""

    def __init__(self, params, num_actions: int):
        self.params = params
        self.num_actions = num_actions
        self._fwd = jax.jit(
            functools.partial(_base_forward, num_actions=num_actions))

    def __call__(self, x_nchw):
        return self._fwd(self.params, x_nchw)


class AdapterWrapper:
    """JAX analog of nn_framework.AdapterWrapper.forward dispatch."""

    def __init__(self, base_model, metadata: Optional[ModelMetadata] = None,
                 forward_fn: Optional[Callable] = None):
        self.base_model = base_model
        self.metadata = metadata
        self.forward_fn = forward_fn

    def __call__(self, x):
        if self.forward_fn is not None:
            return self.forward_fn(self.base_model, x)
        output = self.base_model(x)
        if isinstance(output, tuple) and len(output) == 2:
            return output
        elif isinstance(output, dict):
            return (output['policy'], output['value'])
        raise ValueError('Cannot adapt model output format')


# ----------------------------------------------------------------------------
if __name__ == "__main__":
    # Small shapes consistent with the BaseGameModel contract (8x8 board,
    # 65 actions = 64 squares + pass).  Chid=32 makes the conv output lane
    # width W*Chid = 256 (lane-dense, multiple of 128).
    B, Cin, H, W = 16, 4, 8, 8
    Chid, A = 32, 65
    F = Chid * H * W

    key = jax.random.PRNGKey(0)
    ks = jax.random.split(key, 7)
    x = jax.random.normal(ks[0], (B, Cin, H, W), jnp.float32)

    # deterministic synthetic parameters (shapes follow the torch modules)
    w_conv = jax.random.normal(ks[1], (Chid, Cin, 3, 3), jnp.float32) * 0.1  # OIHW
    b_conv = jax.random.normal(ks[2], (Chid,), jnp.float32) * 0.1
    wp = jax.random.normal(ks[3], (F, A), jnp.float32) * 0.05
    bp = jax.random.normal(ks[4], (A,), jnp.float32) * 0.05
    wv = jax.random.normal(ks[5], (F,), jnp.float32) * 0.05
    bv = jax.random.normal(ks[6], (), jnp.float32) * 0.05

    params = prepare_params(w_conv, b_conv, wp, bp, wv, bv, H, W)
    metadata = ModelMetadata(
        architecture="pallas_conv_policy_value", input_channels=Cin,
        board_height=H, board_width=W, num_actions=A,
        model_params={"hidden_channels": Chid})
    model = AdapterWrapper(PallasBaseGameModel(params, num_actions=A),
                           metadata=metadata)

    policy, value = model(x)
    jax.block_until_ready((policy, value))

    # ---- references ---------------------------------------------------------
    hi = jax.lax.Precision.HIGHEST

    # (1) full-f32 PyTorch-semantics reference (loose tolerance: kernel uses
    #     bf16 MXU operands with f32 accumulation)
    h_ref = jax.lax.conv_general_dilated(
        x, w_conv, window_strides=(1, 1), padding='SAME',
        dimension_numbers=('NCHW', 'OIHW', 'NCHW'), precision=hi)
    h_ref = jnp.maximum(h_ref + b_conv[None, :, None, None], 0.0)
    hflat_ref = h_ref.reshape(B, -1)
    pol_ref = jnp.dot(hflat_ref, wp, precision=hi) + bp
    val_ref = jnp.tanh(jnp.dot(hflat_ref, wv[:, None], precision=hi) + bv)

    # (2) numerics-matched reference: same bf16 matmul inputs / f32 accumulation
    def bf(z):
        return z.astype(jnp.bfloat16).astype(jnp.float32)

    h_m = jax.lax.conv_general_dilated(
        bf(x), bf(w_conv), window_strides=(1, 1), padding='SAME',
        dimension_numbers=('NCHW', 'OIHW', 'NCHW'), precision=hi)
    h_m = jnp.maximum(h_m + b_conv[None, :, None, None], 0.0)
    hflat_m = bf(h_m.reshape(B, -1))
    pol_m = jnp.dot(hflat_m, bf(wp), precision=hi) + bp
    val_m = jnp.tanh(jnp.dot(hflat_m, bf(wv)[:, None], precision=hi) + bv)

    assert policy.shape == (B, A) and value.shape == (B, 1)
    assert jnp.allclose(policy, pol_m, rtol=1e-2, atol=1e-2), "policy vs matched ref"
    assert jnp.allclose(value, val_m, rtol=1e-2, atol=1e-2), "value vs matched ref"
    assert jnp.allclose(policy, pol_ref, rtol=1e-1, atol=1e-1), "policy vs f32 ref"
    assert jnp.allclose(value, val_ref, rtol=1e-1, atol=1e-1), "value vs f32 ref"

    print("KERNEL_OK")
</pallas_src>

<mosaic_0001>
module attributes {stable_mosaic.version = 11 : i64} {
  func.func @fused_game_model_kernel(%arg0: i32, %arg1: memref<8x10x40xf32, #tpu.memory_space<vmem>>, %arg2: memref<120x256xbf16, #tpu.memory_space<vmem>>, %arg3: memref<1x256xf32, #tpu.memory_space<vmem>>, %arg4: memref<2048x128xbf16, #tpu.memory_space<vmem>>, %arg5: memref<1x128xf32, #tpu.memory_space<vmem>>, %arg6: memref<8x128xf32, #tpu.memory_space<vmem>>) attributes {dimension_semantics = [#tpu.dimension_semantics<parallel>], iteration_bounds = array<i64: 2>, scalar_prefetch = 0 : i64, scratch_operands = 0 : i64, tpu.core_type = #tpu.core_type<tc>, window_params = [{transform_indices = @transform_0, window_bounds = array<i64: 8, 10, 40>}, {pipeline_mode = #tpu.pipeline_mode<synchronous>, transform_indices = @transform_1, window_bounds = array<i64: 120, 256>}, {pipeline_mode = #tpu.pipeline_mode<synchronous>, transform_indices = @transform_2, window_bounds = array<i64: 1, 256>}, {pipeline_mode = #tpu.pipeline_mode<synchronous>, transform_indices = @transform_3, window_bounds = array<i64: 2048, 128>}, {pipeline_mode = #tpu.pipeline_mode<synchronous>, transform_indices = @transform_4, window_bounds = array<i64: 1, 128>}, {transform_indices = @transform_5, window_bounds = array<i64: 8, 128>}]} {
    %c0 = arith.constant 0 : index
    %c0_0 = arith.constant 0 : index
    %c0_1 = arith.constant 0 : index
    %0 = vector.load %arg1[%c0, %c0_0, %c0_1] : memref<8x10x40xf32, #tpu.memory_space<vmem>>, vector<8x10x40xf32>
    %1 = vector.extract_strided_slice %0 {offsets = [0, 0, 0], sizes = [8, 8, 40], strides = [1, 1, 1]} : vector<8x10x40xf32> to vector<8x8x40xf32>
    %2 = vector.shape_cast %1 : vector<8x8x40xf32> to vector<64x40xf32>
    %3 = vector.extract_strided_slice %0 {offsets = [0, 1, 0], sizes = [8, 8, 40], strides = [1, 1, 1]} : vector<8x10x40xf32> to vector<8x8x40xf32>
    %4 = vector.shape_cast %3 : vector<8x8x40xf32> to vector<64x40xf32>
    %5 = vector.extract_strided_slice %0 {offsets = [0, 2, 0], sizes = [8, 8, 40], strides = [1, 1, 1]} : vector<8x10x40xf32> to vector<8x8x40xf32>
    %6 = vector.shape_cast %5 : vector<8x8x40xf32> to vector<64x40xf32>
    %7 = tpu.concatenate %2, %4, %6 in 1 : vector<64x40xf32>, vector<64x40xf32>, vector<64x40xf32> -> vector<64x120xf32>
    %8 = arith.truncf %7 : vector<64x120xf32> to vector<64x120xbf16>
    %c0_2 = arith.constant 0 : index
    %c0_3 = arith.constant 0 : index
    %9 = vector.load %arg2[%c0_2, %c0_3] : memref<120x256xbf16, #tpu.memory_space<vmem>>, vector<120x256xbf16>
    %cst = arith.constant dense<0.000000e+00> : vector<64x256xf32>
    %10 = tpu.matmul %8, %9, %cst {dimension_numbers = #tpu.dot_dimension_numbers<[1], [0], [0], [1], [0, 0, 1, 1], [], []>} : vector<64x120xbf16>, vector<120x256xbf16>, vector<64x256xf32> -> vector<64x256xf32>
    %c0_4 = arith.constant 0 : index
    %c0_5 = arith.constant 0 : index
    %11 = vector.load %arg3[%c0_4, %c0_5] : memref<1x256xf32, #tpu.memory_space<vmem>>, vector<1x256xf32>
    %12 = vector.broadcast %11 : vector<1x256xf32> to vector<64x256xf32>
    %13 = arith.addf %10, %12 : vector<64x256xf32>
    %cst_6 = arith.constant 0.000000e+00 : f32
    %14 = vector.broadcast %cst_6 : f32 to vector<64x256xf32>
    %15 = arith.maximumf %13, %14 : vector<64x256xf32>
    %16 = vector.shape_cast %15 : vector<64x256xf32> to vector<8x8x256xf32>
    %17 = vector.extract_strided_slice %16 {offsets = [0, 0, 0], sizes = [8, 1, 256], strides = [1, 1, 1]} : vector<8x8x256xf32> to vector<8x1x256xf32>
    %18 = vector.shape_cast %17 : vector<8x1x256xf32> to vector<8x256xf32>
    %19 = vector.extract_strided_slice %16 {offsets = [0, 1, 0], sizes = [8, 1, 256], strides = [1, 1, 1]} : vector<8x8x256xf32> to vector<8x1x256xf32>
    %20 = vector.shape_cast %19 : vector<8x1x256xf32> to vector<8x256xf32>
    %21 = vector.extract_strided_slice %16 {offsets = [0, 2, 0], sizes = [8, 1, 256], strides = [1, 1, 1]} : vector<8x8x256xf32> to vector<8x1x256xf32>
    %22 = vector.shape_cast %21 : vector<8x1x256xf32> to vector<8x256xf32>
    %23 = vector.extract_strided_slice %16 {offsets = [0, 3, 0], sizes = [8, 1, 256], strides = [1, 1, 1]} : vector<8x8x256xf32> to vector<8x1x256xf32>
    %24 = vector.shape_cast %23 : vector<8x1x256xf32> to vector<8x256xf32>
    %25 = vector.extract_strided_slice %16 {offsets = [0, 4, 0], sizes = [8, 1, 256], strides = [1, 1, 1]} : vector<8x8x256xf32> to vector<8x1x256xf32>
    %26 = vector.shape_cast %25 : vector<8x1x256xf32> to vector<8x256xf32>
    %27 = vector.extract_strided_slice %16 {offsets = [0, 5, 0], sizes = [8, 1, 256], strides = [1, 1, 1]} : vector<8x8x256xf32> to vector<8x1x256xf32>
    %28 = vector.shape_cast %27 : vector<8x1x256xf32> to vector<8x256xf32>
    %29 = vector.extract_strided_slice %16 {offsets = [0, 6, 0], sizes = [8, 1, 256], strides = [1, 1, 1]} : vector<8x8x256xf32> to vector<8x1x256xf32>
    %30 = vector.shape_cast %29 : vector<8x1x256xf32> to vector<8x256xf32>
    %31 = vector.extract_strided_slice %16 {offsets = [0, 7, 0], sizes = [8, 1, 256], strides = [1, 1, 1]} : vector<8x8x256xf32> to vector<8x1x256xf32>
    %32 = vector.shape_cast %31 : vector<8x1x256xf32> to vector<8x256xf32>
    %33 = tpu.concatenate %18, %20, %22, %24, %26, %28, %30, %32 in 1 : vector<8x256xf32>, vector<8x256xf32>, vector<8x256xf32>, vector<8x256xf32>, vector<8x256xf32>, vector<8x256xf32>, vector<8x256xf32>, vector<8x256xf32> -> vector<8x2048xf32>
    %34 = arith.truncf %33 : vector<8x2048xf32> to vector<8x2048xbf16>
    %c0_7 = arith.constant 0 : index
    %c0_8 = arith.constant 0 : index
    %35 = vector.load %arg4[%c0_7, %c0_8] : memref<2048x128xbf16, #tpu.memory_space<vmem>>, vector<2048x128xbf16>
    %cst_9 = arith.constant dense<0.000000e+00> : vector<8x128xf32>
    %36 = tpu.matmul %34, %35, %cst_9 {dimension_numbers = #tpu.dot_dimension_numbers<[1], [0], [0], [1], [0, 0, 1, 1], [], []>} : vector<8x2048xbf16>, vector<2048x128xbf16>, vector<8x128xf32> -> vector<8x128xf32>
    %c0_10 = arith.constant 0 : index
    %c0_11 = arith.constant 0 : index
    %37 = vector.load %arg5[%c0_10, %c0_11] : memref<1x128xf32, #tpu.memory_space<vmem>>, vector<1x128xf32>
    %38 = vector.broadcast %37 : vector<1x128xf32> to vector<8x128xf32>
    %39 = arith.addf %36, %38 : vector<8x128xf32>
    %40 = tpu.iota {dimensions = array<i32: 1>} : vector<8x128xi32>
    %c65_i32 = arith.constant 65 : i32
    %41 = vector.broadcast %c65_i32 : i32 to vector<8x128xi32>
    %42 = arith.cmpi eq, %40, %41 : vector<8x128xi32>
    %43 = math.tanh %39 : vector<8x128xf32>
    %44 = arith.select %42, %43, %39 : vector<8x128xi1>, vector<8x128xf32>
    %c0_12 = arith.constant 0 : index
    %c0_13 = arith.constant 0 : index
    %45 = vector.load %arg6[%c0_12, %c0_13] : memref<8x128xf32, #tpu.memory_space<vmem>>, vector<8x128xf32>
    tpu.vector_store %arg6[%c0_12, %c0_13], %44 {strides = array<i32>} : memref<8x128xf32, #tpu.memory_space<vmem>>, vector<8x128xf32>,
    return
  }
  func.func @transform_0(%arg0: i32) -> (i32, i32, i32) {
    %c0_i32 = arith.constant 0 : i32
    %c0_i32_0 = arith.constant 0 : i32
    %c0_i32_1 = arith.constant 0 : i32
    return %arg0, %c0_i32, %c0_i32_0 : i32, i32, i32
  }
  func.func @transform_1(%arg0: i32) -> (i32, i32) {
    %c0_i32 = arith.constant 0 : i32
    %c0_i32_0 = arith.constant 0 : i32
    %c0_i32_1 = arith.constant 0 : i32
    return %c0_i32, %c0_i32_0 : i32, i32
  }
  func.func @transform_2(%arg0: i32) -> (i32, i32) {
    %c0_i32 = arith.constant 0 : i32
    %c0_i32_0 = arith.constant 0 : i32
    %c0_i32_1 = arith.constant 0 : i32
    return %c0_i32, %c0_i32_0 : i32, i32
  }
  func.func @transform_3(%arg0: i32) -> (i32, i32) {
    %c0_i32 = arith.constant 0 : i32
    %c0_i32_0 = arith.constant 0 : i32
    %c0_i32_1 = arith.constant 0 : i32
    return %c0_i32, %c0_i32_0 : i32, i32
  }
  func.func @transform_4(%arg0: i32) -> (i32, i32) {
    %c0_i32 = arith.constant 0 : i32
    %c0_i32_0 = arith.constant 0 : i32
    %c0_i32_1 = arith.constant 0 : i32
    return %c0_i32, %c0_i32_0 : i32, i32
  }
  func.func @transform_5(%arg0: i32) -> (i32, i32) {
    %c0_i32 = arith.constant 0 : i32
    %c0_i32_0 = arith.constant 0 : i32
    return %arg0, %c0_i32 : i32, i32
  }
}

</mosaic_0001>

<bundles_post_ra>
// kernel: _base_forward.1
= control target key start
LH: loop header
LB: loop body
LE: loop exit
PB: predicated region body
PF: predicated region fallthrough
CT: control target
= control target key end

     0   :  { %s2967_s18 = smov 0   ;;  %s3913_s0 = inlined_call_operand.vmem [shape: f32[16,10,40], index: 0, kind: input, shape index: {}]   ;;  %s3914_s1 = inlined_call_operand.vmem [shape: bf16[120,256], index: 1, kind: input, shape index: {}]   ;;  %s3915_s2 = inlined_call_operand.vmem [shape: f32[1,256], index: 2, kind: input, shape index: {}]   ;;  %s3916_s3 = inlined_call_operand.vmem [shape: bf16[2048,128], index: 3, kind: input, shape index: {}]   ;;  %s3917_s4 = inlined_call_operand.vmem [shape: f32[1,128], index: 4, kind: input, shape index: {}]   ;;  %s3918_s5 = inlined_call_operand.vmem [shape: f32[16,128], index: 5, kind: output, shape index: {}]  }
   0x1 LB: > { %s2973_s19 = sadd.s32 4294967295, %s2933_s18   ;;  %p2148_p0 = scmp.ge.s32.totalorder %s2933_s18, 1  ;;  %s2933_s18 = sphi %s2967_s18, %s15_s18  }
   0x2   : > { %p189_p1 = scmp.lt.s32.totalorder %s2933_s18, 3 }
   0x4   : > { %p190_p2 = pnand %p2148_p0, %p189_p1 }
   0x5   : > { %s2149_s20 = sshll.u32 (!%p190_p2), %s2973_s19, 3  ;;  %s2935_s28 = smov (!%p190_p2), 40  }
   0x6   : > { %193 = sbr.rel (%p190_p2) target bundleno = 583 (0x247), region = 40  ;;  %p218_p3 = scmp.lt.s32.totalorder (!%p190_p2), %s2149_s20, 15 }
   0x7   : > { %s2936_s12 = smov (!%p190_p2), 80   ;;  %p224_p4 = scmp.lt.s32.totalorder (!%p190_p2), %s2973_s19, 1 }
   0xb   : > { %v394_v0 = vld [vmem:[%s3914_s1 + $0x70] sm:$0xff]  ;;  %s3920_s20 = smov (!%p218_p3, %s2149_s20), 15  ;;  %vm489_vm0 = vcmask 1043456   ;;  %v2203_v3 = vld [vmem:[%s3914_s1 + $0x60] sm:$0xf]  ;;  %vm260_vm1 = vcmask 1046528  }
   0xc   : > { %v444_v1 = vunpack.c.l.b16 %v394_v0  ;;  %v445_v2 = vunpack.c.h.b16 %v394_v0  ;;  %v2745_v6 = vld [vmem:[%s3914_s1 + $0x64] sm:$0xf0]  ;;  %v2744_v7 = vld [vmem:[%s3914_s1 + $0x64] sm:$0xf]  ;;  %v2205_v8 = vld [vmem:[%s3914_s1 + $0x68] sm:$0xf0] }
   0xd   : > { %s2731_s6 = sshll.u32 %s3920_s20, 4  ;;  %v2996_v9 = vld [vmem:[%s3914_s1 + $0x50] sm:$0xf]  ;;  %v3001_v10 = vld [vmem:[%s3914_s1 + $0x54] sm:$0xf0]  ;;  %vm285_vm2 = vcmask 1045504   ;;  %v2204_v18 = vor.u32 %v2745_v6, %v2203_v3  ;;  %v2208_v19 = vor.u32 %v2744_v7, %v2205_v8 }
   0xe   : > { %v460_v4 = vpack.c.b16 %v444_v1, %v444_v1  ;;  %v461_v5 = vpack.c.b16 %v445_v2, %v445_v2  ;;  %s3006_s13 = scalar_lea.vmem %s3913_s0, %s2731_s6  ;;  %v2742_v13 = vld [vmem:[%s3914_s1 + $0x54] sm:$0xf]  ;;  %v2197_v14 = vld [vmem:[%s3914_s1 + $0x58] sm:$0xf0]  ;;  %v2196_v36 = vor.u32 %v3001_v10, %v2996_v9  ;;  %v2187_v37 = vld [vmem:[%s3914_s1 + $0x40] sm:$0xf] }
   0xf   : > { %v3015_v15 = vld [vmem:[%s3006_s13] sm:$0xff]  ;;  %v229_v16 = vld [vmem:[%s3006_s13 + $0x8] sm:$0x3]  ;;  %v3019_v17 = vld [vmem:[%s3006_s13 + $0x10] sm:$0xff]  ;;  %v2200_v46 = vor.u32 %v2742_v13, %v2197_v14  ;;  %vm358_vm3 = vcmask 326656   ;;  %vm367_vm4 = vcmask 654336  }
  0x10   : > { %v491_v11 = vsel %vm489_vm0, %v460_v4, 0  ;;  %v494_v12 = vsel %vm489_vm0, %v461_v5, 0  ;;  %v231_v20 = vld [vmem:[%s3006_s13 + $0x18] sm:$0x3]  ;;  %v261_v21 = vrot.slane %v3015_v15, 1  ;;  %v262_v22 = vrot.slane %v229_v16, 1 }
  0x11   : > { %496 = vmatpush.bf16.msra.mxu0 %v491_v11  ;;  %525 = vmatpush.bf16.msra.mxu1 %v494_v12  ;;  %v264_v23 = vrot.slane %v3019_v17, 1  ;;  %v287_v24 = vrot.slane %v229_v16, 2  ;;  %v265_v25 = vrot.slane %v231_v20, 1  ;;  %v290_v26 = vrot.slane %v231_v20, 2  ;;  %v3027_v29 = vld [vmem:[%s3006_s13 + $0x20] sm:$0xff]  ;;  %v3030_v30 = vld [vmem:[%s3006_s13 + $0x30] sm:$0xff] }
  0x12   : > { %v286_v27 = vrot.slane %v3015_v15, 2  ;;  %v289_v28 = vrot.slane %v3019_v17, 2  ;;  %v263_v31 = vsel %vm260_vm1, %v261_v21, %v262_v22  ;;  %v233_v32 = vld [vmem:[%s3006_s13 + $0x28] sm:$0x3]  ;;  %v235_v33 = vld [vmem:[%s3006_s13 + $0x38] sm:$0x3] }
  0x13   : > { %v267_v34 = vrot.slane %v3027_v29, 1  ;;  %v270_v35 = vrot.slane %v3030_v30, 1  ;;  %v2741_v38 = vld [vmem:[%s3914_s1 + $0x44] sm:$0xf0]  ;;  %v2740_v39 = vld [vmem:[%s3914_s1 + $0x44] sm:$0xf]  ;;  %v266_v40 = vsel %vm260_vm1, %v264_v23, %v265_v25 }
  0x14   : > { %v288_v41 = vsel %vm285_vm2, %v286_v27, %v287_v24  ;;  %v268_v42 = vrot.slane %v233_v32, 1  ;;  %v3051_v43 = vld [vmem:[%s3006_s13 + $0x40] sm:$0xff]  ;;  %v237_v44 = vld [vmem:[%s3006_s13 + $0x48] sm:$0x3]  ;;  %v3055_v45 = vld [vmem:[%s3006_s13 + $0x50] sm:$0xff]  ;;  %v2884_v47 = vpack.i.bf16 %v266_v40, %v263_v31  ;;  %v291_v48 = vsel %vm285_vm2, %v289_v28, %v290_v26  ;;  %s3922_s19 = smov (!%p224_p4, %s2973_s19), 1 }
  0x15   : > { %497 = vmatpush.bf16.msra.mxu0 %v2204_v18  ;;  %526 = vmatpush.bf16.msra.mxu1 %v2208_v19  ;;  %v271_v49 = vrot.slane %v235_v33, 1  ;;  %v293_v50 = vrot.slane %v233_v32, 2  ;;  %v239_v51 = vld [vmem:[%s3006_s13 + $0x58] sm:$0x3]  ;;  %v2189_v52 = vld [vmem:[%s3914_s1 + $0x48] sm:$0xf0]  ;;  %v2188_v0 = vor.u32 %v2741_v38, %v2187_v37  ;;  %v2889_v6 = vpack.i.bf16 %v291_v48, %v288_v41 }
  0x16   : > { %v269_v53 = vsel %vm260_vm1, %v267_v34, %v268_v42  ;;  %v296_v54 = vrot.slane %v235_v33, 2  ;;  %v292_v55 = vrot.slane %v3027_v29, 2  ;;  %v295_v56 = vrot.slane %v3030_v30, 2  ;;  %2885 = vrot.lane.b32.xlu0 %v2884_v47, %s2935_s28  ;;  %v3070_v63 = vld [vmem:[%s3006_s13 + $0x60] sm:$0xff]  ;;  %v241_v3 = vld [vmem:[%s3006_s13 + $0x68] sm:$0x3] }
  0x17   : > { %v272_v57 = vsel %vm260_vm1, %v270_v35, %v271_v49  ;;  %v273_v58 = vrot.slane %v3051_v43, 1  ;;  %v274_v59 = vrot.slane %v237_v44, 1  ;;  %v276_v60 = vrot.slane %v3055_v45, 1  ;;  %v3075_v4 = vld [vmem:[%s3006_s13 + $0x70] sm:$0xff]  ;;  %v243_v5 = vld [vmem:[%s3006_s13 + $0x78] sm:$0x3] }
  0x18   : > { %v2894_v61 = vpack.i.bf16 %v272_v57, %v269_v53  ;;  %v277_v62 = vrot.slane %v239_v51, 1  ;;  %v2192_v1 = vor.u32 %v2740_v39, %v2189_v52  ;;  %v294_v7 = vsel %vm285_vm2, %v292_v55, %v293_v50  ;;  %v2179_v10 = vld [vmem:[%s3914_s1 + $0x30] sm:$0xf]  ;;  %v2739_v11 = vld [vmem:[%s3914_s1 + $0x34] sm:$0xf0]  ;;  %s2152_s23 = sshll.u32 %s3922_s19, 3 }
  0x19   : > { %498 = vmatpush.bf16.msra.mxu0 %v2196_v36  ;;  %527 = vmatpush.bf16.msra.mxu1 %v2200_v46  ;;  %v275_v2 = vsel %vm260_vm1, %v273_v58, %v274_v59  ;;  %v299_v9 = vrot.slane %v237_v44, 2  ;;  %v297_v12 = vsel %vm285_vm2, %v295_v56, %v296_v54  ;;  %v302_v13 = vrot.slane %v239_v51, 2  ;;  %v2738_v18 = vld [vmem:[%s3914_s1 + $0x34] sm:$0xf]  ;;  %v2181_v19 = vld [vmem:[%s3914_s1 + $0x38] sm:$0xf0]  ;;  %s227_s26 = scalar_lea.vmem %s3918_s5, %s2152_s23 }
  0x1a   : > { %2895 = vrot.lane.b32.xlu1 %v2894_v61, %s2935_s28  ;;  %v278_v8 = vsel %vm260_vm1, %v276_v60, %v277_v62  ;;  %v279_v16 = vrot.slane %v3070_v63, 1  ;;  %v280_v20 = vrot.slane %v241_v3, 1  ;;  %v282_v21 = vrot.slane %v3075_v4, 1  ;;  %v2171_v44 = vld [vmem:[%s3914_s1 + $0x20] sm:$0xf] }
  0x1b   : > { %v2904_v14 = vpack.i.bf16 %v278_v8, %v275_v2  ;;  %v283_v22 = vrot.slane %v243_v5, 1  ;;  %v298_v23 = vrot.slane %v3051_v43, 2  ;;  %v301_v24 = vrot.slane %v3055_v45, 2  ;;  %v2737_v46 = vld [vmem:[%s3914_s1 + $0x24] sm:$0xf0] }
  0x1c   : > { %v2180_v25 = vor.u32 %v2739_v11, %v2179_v10  ;;  %v2899_v26 = vpack.i.bf16 %v297_v12, %v294_v7  ;;  %v304_v27 = vrot.slane %v3070_v63, 2  ;;  %v2184_v31 = vor.u32 %v2738_v18, %v2181_v19  ;;  %v2736_v47 = vld [vmem:[%s3914_s1 + $0x24] sm:$0xf]  ;;  %v2173_v49 = vld [vmem:[%s3914_s1 + $0x28] sm:$0xf0] }
  0x1d   : > { %499 = vmatpush.bf16.msra.mxu0 %v2188_v0  ;;  %528 = vmatpush.bf16.msra.mxu1 %v2192_v1  ;;  %v300_v28 = vsel %vm285_vm2, %v298_v23, %v299_v9  ;;  %v305_v32 = vrot.slane %v241_v3, 2  ;;  %v307_v33 = vrot.slane %v3075_v4, 2  ;;  %v308_v34 = vrot.slane %v243_v5, 2  ;;  %v2163_v51 = vld [vmem:[%s3914_s1 + $0x10] sm:$0xf] }
  0x1e   : > { %2905 = vrot.lane.b32.xlu2 %v2904_v14, %s2935_s28  ;;  %2890 = vrot.lane.b32.xlu0 %v2889_v6, %s2936_s12  ;;  %v303_v35 = vsel %vm285_vm2, %v301_v24, %v302_v13  ;;  %v281_v36 = vsel %vm260_vm1, %v279_v16, %v280_v20  ;;  %v284_v37 = vsel %vm260_vm1, %v282_v21, %v283_v22  ;;  %v2735_v52 = vld [vmem:[%s3914_s1 + $0x14] sm:$0xf0]  ;;  %v2734_v53 = vld [vmem:[%s3914_s1 + $0x14] sm:$0xf]  ;;  %vm476_vm5 = vcmask 982016  }
  0x1f   : > { %v2909_v38 = vpack.i.bf16 %v303_v35, %v300_v28  ;;  %v2914_v39 = vpack.i.bf16 %v284_v37, %v281_v36  ;;  %v306_v40 = vsel %vm285_vm2, %v304_v27, %v305_v32  ;;  %v309_v41 = vsel %vm285_vm2, %v307_v33, %v308_v34  ;;  %v2165_v55 = vld [vmem:[%s3914_s1 + $0x18] sm:$0xf0]  ;;  %v2155_v57 = vld [vmem:[%s3914_s1] sm:$0xf]  ;;  %v2733_v58 = vld [vmem:[%s3914_s1 + $0x4] sm:$0xf0] }
  0x20   : > { %v2919_v42 = vpack.i.bf16 %v309_v41, %v306_v40  ;;  %v2172_v48 = vor.u32 %v2737_v46, %v2171_v44  ;;  %v2176_v50 = vor.u32 %v2736_v47, %v2173_v49  ;;  %v2164_v54 = vor.u32 %v2735_v52, %v2163_v51  ;;  %v2732_v59 = vld [vmem:[%s3914_s1 + $0x4] sm:$0xf]  ;;  %v2157_v61 = vld [vmem:[%s3914_s1 + $0x8] sm:$0xf0]  ;;  %v2753_v44 = vld [vmem:[%s3916_s3 + $0x38] sm:$0xff] }
  0x21   : > { %500 = vmatpush.bf16.msra.mxu0 %v2180_v25  ;;  %529 = vmatpush.bf16.msra.mxu1 %v2184_v31  ;;  %v2168_v56 = vor.u32 %v2734_v53, %v2165_v55  ;;  %v2156_v60 = vor.u32 %v2733_v58, %v2155_v57  ;;  %v2160_v62 = vor.u32 %v2732_v59, %v2157_v61  ;;  %v2793_v46 = vld [vmem:[%s3916_s3 + $0x178] sm:$0xff]  ;;  %v2752_v47 = vld [vmem:[%s3916_s3 + $0x30] sm:$0xff]  ;;  %v2751_v51 = vld [vmem:[%s3916_s3 + $0x28] sm:$0xff]  ;;  %vm587_vm6 = vcmask 1041409  }
  0x22   : > { %2900 = vrot.lane.b32.xlu1 %v2899_v26, %s2936_s12  ;;  %1877 = vmatpush.bf16.msra.mxu2 %v2753_v44  ;;  %v2784_v49 = vld [vmem:[%s3916_s3 + $0x130] sm:$0xff]  ;;  %v2759_v52 = vld [vmem:[%s3916_s3 + $0x68] sm:$0xff]  ;;  %v2750_v55 = vld [vmem:[%s3916_s3 + $0x20] sm:$0xff]  ;;  %vm590_vm7 = vcmask 1042434   ;;  %vm593_vm8 = vcmask 1043459   ;;  %vm596_vm9 = vcmask 1044484  }
  0x23   : > { %v2783_v53 = vld [vmem:[%s3916_s3 + $0x128] sm:$0xff]  ;;  %v2782_v57 = vld [vmem:[%s3916_s3 + $0x120] sm:$0xff]  ;;  %v2749_v59 = vld [vmem:[%s3916_s3 + $0x18] sm:$0xff]  ;;  %vm599_vm10 = vcmask 1045509   ;;  %vm602_vm11 = vcmask 1046534   ;;  %vm605_vm12 = vcmask 1047559  }
  0x24   : > { %v2790_v58 = vld [vmem:[%s3916_s3 + $0x160] sm:$0xff]  ;;  %v2781_v61 = vld [vmem:[%s3916_s3 + $0x118] sm:$0xff] }
  0x25   : > { %501 = vmatpush.bf16.msra.mxu0 %v2172_v48  ;;  %530 = vmatpush.bf16.msra.mxu1 %v2176_v50  ;;  %v2760_v48 = vld [vmem:[%s3916_s3 + $0x70] sm:$0xff] }
  0x26   : > { %2910 = vrot.lane.b32.xlu2 %v2909_v38, %s2936_s12  ;;  %2915 = vrot.lane.b32.xlu0 %v2914_v39, %s2935_s28  ;;  %v2792_v50 = vld [vmem:[%s3916_s3 + $0x170] sm:$0xff] }
  0x27   : > { %1878 = vmatpush.bf16.msra.mxu2 %v2752_v47  ;;  %v2821_v47 = vld [vmem:[%s3916_s3 + $0x258] sm:$0xff] }
  0x29   : > { %502 = vmatpush.bf16.msra.mxu0 %v2164_v54  ;;  %531 = vmatpush.bf16.msra.mxu1 %v2168_v56  ;;  %v2791_v54 = vld [vmem:[%s3916_s3 + $0x168] sm:$0xff]  ;;  %v2758_v56 = vld [vmem:[%s3916_s3 + $0x60] sm:$0xff] }
  0x2a   : > { %2920 = vrot.lane.b32.xlu1 %v2919_v42, %s2936_s12 }
  0x2b   : > { %1879 = vmatpush.bf16.msra.mxu2 %v2751_v51 }
  0x2d   : > { %503 = vmatpush.bf16.msra.mxu0 %v2156_v60  ;;  %532 = vmatpush.bf16.msra.mxu1 %v2160_v62  ;;  %v2757_v60 = vld [vmem:[%s3916_s3 + $0x58] sm:$0xff] }
  0x2e   : > { %v2789_v62 = vld [vmem:[%s3916_s3 + $0x158] sm:$0xff] }
  0x2f   : > { %1880 = vmatpush.bf16.msra.mxu2 %v2750_v55 }
  0x31   : > { %1942 = vmatpush.bf16.msrb.mxu1 %v2793_v46  ;;  %v2813_v46 = vld [vmem:[%s3916_s3 + $0x218] sm:$0xff] }
  0x33   : > { %1881 = vmatpush.bf16.msra.mxu2 %v2749_v59  ;;  %v2812_v59 = vld [vmem:[%s3916_s3 + $0x210] sm:$0xff] }
  0x35   : > { %1943 = vmatpush.bf16.msrb.mxu1 %v2792_v50 }
  0x39   : > { %1944 = vmatpush.bf16.msrb.mxu1 %v2791_v54 }
  0x3d   : > { %1945 = vmatpush.bf16.msrb.mxu1 %v2790_v58 }
  0x41   : > { %1946 = vmatpush.bf16.msrb.mxu1 %v2789_v62 }
  0x78   : > { %v2906_v20 = vpop.permute.xlu2 %2905 }
  0x79   : > { %v2908_v24 = vunpack.i.h.bf16 %v2906_v20  ;;  %v2907_v25 = vunpack.i.l.bf16 %v2906_v20  ;;  %v2776_v20 = vld [vmem:[%s3916_s3 + $0xf0] sm:$0xff] }
  0x80   : > { %v2911_v26 = vpop.permute.xlu2 %2910 }
  0x81   : > { %v2913_v27 = vunpack.i.h.bf16 %v2911_v26  ;;  %v2912_v28 = vunpack.i.l.bf16 %v2911_v26  ;;  %v2767_v26 = vld [vmem:[%s3916_s3 + $0xa8] sm:$0xff] }
  0x88   : > { %v2886_v0 = vpop.permute.xlu0 %2885 }
  0x89   : > { %v2888_v1 = vunpack.i.h.bf16 %v2886_v0  ;;  %v2887_v2 = vunpack.i.l.bf16 %v2886_v0  ;;  %v2748_v0 = vld [vmem:[%s3916_s3 + $0x10] sm:$0xff] }
  0x8a   : > { %1882 = vmatpush.bf16.msra.mxu2 %v2748_v0 }
  0x8b   : > { %v360_v8 = vsel %vm358_vm3, %v3019_v17, %v2888_v1  ;;  %v359_v9 = vsel %vm358_vm3, %v3015_v15, %v2887_v2  ;;  %v2756_v1 = vld [vmem:[%s3916_s3 + $0x50] sm:$0xff] }
  0x8c   : > { %v2896_v5 = vpop.permute.xlu1 %2895  ;;  %v2780_v2 = vld [vmem:[%s3916_s3 + $0x110] sm:$0xff] }
  0x8d   : > { %v2898_v13 = vunpack.i.h.bf16 %v2896_v5  ;;  %v2897_v14 = vunpack.i.l.bf16 %v2896_v5  ;;  %v2747_v5 = vld [vmem:[%s3916_s3 + $0x8] sm:$0xff] }
  0x8e   : > { %1883 = vmatpush.bf16.msra.mxu2 %v2747_v5  ;;  %v2763_v5 = vld [vmem:[%s3916_s3 + $0x88] sm:$0xff] }
  0x8f   : > { %v362_v17 = vsel %vm358_vm3, %v3030_v30, %v2898_v13  ;;  %v361_v15 = vsel %vm358_vm3, %v3027_v29, %v2897_v14  ;;  %v364_v30 = vsel %vm358_vm3, %v3055_v45, %v2908_v24  ;;  %v363_v29 = vsel %vm358_vm3, %v3051_v43, %v2907_v25  ;;  %v2769_v13 = vld [vmem:[%s3916_s3 + $0xb8] sm:$0xff]  ;;  %v2824_v24 = vld [vmem:[%s3916_s3 + $0x270] sm:$0xff]  ;;  %v395_v25 = vld [vmem:[%s3915_s2] sm:$0x3] }
  0x90   : > { %v2891_v3 = vpop.permute.xlu0 %2890  ;;  %v372_v31 = vsel %vm367_vm4, %v363_v29, %v2912_v28  ;;  %v373_v32 = vsel %vm367_vm4, %v364_v30, %v2913_v27  ;;  %v2777_v14 = vld [vmem:[%s3916_s3 + $0xf8] sm:$0xff]  ;;  %v2775_v27 = vld [vmem:[%s3916_s3 + $0xe8] sm:$0xff]  ;;  %v3311_v29 = vperm.slane %v395_v25, 0 }
  0x91   : > { %v2893_v6 = vunpack.i.h.bf16 %v2891_v3  ;;  %v2892_v7 = vunpack.i.l.bf16 %v2891_v3  ;;  %v378_v33 = vpack.c.bf16 %v373_v32, %v372_v31  ;;  %v2788_v3 = vld [vmem:[%s3916_s3 + $0x150] sm:$0xff]  ;;  %v2815_v28 = vld [vmem:[%s3916_s3 + $0x228] sm:$0xff]  ;;  %v3313_v31 = vperm.slane %v395_v25, 1 }
  0x92   : > { %1947 = vmatpush.bf16.msrb.mxu1 %v2788_v3  ;;  %v2823_v30 = vld [vmem:[%s3916_s3 + $0x268] sm:$0xff] }
  0x93   : > { %v368_v10 = vsel %vm367_vm4, %v359_v9, %v2892_v7  ;;  %v369_v11 = vsel %vm367_vm4, %v360_v8, %v2893_v6  ;;  %v2755_v6 = vld [vmem:[%s3916_s3 + $0x48] sm:$0xff] }
  0x94   : > { %v376_v12 = vpack.c.bf16 %v369_v11, %v368_v10  ;;  %v2901_v16 = vpop.permute.xlu1 %2900  ;;  %v2779_v7 = vld [vmem:[%s3916_s3 + $0x108] sm:$0xff]  ;;  %v2746_v11 = vld [vmem:[%s3916_s3] sm:$0xff] }
  0x95   : > { %v2903_v18 = vunpack.i.h.bf16 %v2901_v16  ;;  %v2902_v19 = vunpack.i.l.bf16 %v2901_v16  ;;  %v2787_v8 = vld [vmem:[%s3916_s3 + $0x148] sm:$0xff]  ;;  %v2778_v16 = vld [vmem:[%s3916_s3 + $0x100] sm:$0xff]  ;;  %1884 = vmatpush.bf16.msra.mxu2 %v2746_v11 }
  0x96   : > { %2209 = vmatmul.msk.bf16.vlgmr.msra.gmra.mxu0 %vm476_vm5, %v376_v12  ;;  %2213 = vmatmul.msk.bf16.vlgmr.msra.gmra.mxu1 %vm476_vm5, %v376_v12  ;;  %v2754_v12 = vld [vmem:[%s3916_s3 + $0x40] sm:$0xff]  ;;  %v2819_v11 = vld [vmem:[%s3916_s3 + $0x248] sm:$0xff] }
  0x97   : > { %v370_v21 = vsel %vm367_vm4, %v361_v15, %v2902_v19  ;;  %v371_v22 = vsel %vm367_vm4, %v362_v17, %v2903_v18  ;;  %1948 = vmatpush.bf16.msrb.mxu1 %v2787_v8  ;;  %v2786_v18 = vld [vmem:[%s3916_s3 + $0x140] sm:$0xff]  ;;  %v2817_v19 = vld [vmem:[%s3916_s3 + $0x238] sm:$0xff]  ;;  %v2768_v15 = vld [vmem:[%s3916_s3 + $0xb0] sm:$0xff] }
  0x98   : > { %v377_v23 = vpack.c.bf16 %v371_v22, %v370_v21  ;;  %v2916_v34 = vpop.permute.xlu0 %2915  ;;  %v2825_v17 = vld [vmem:[%s3916_s3 + $0x278] sm:$0xff] }
  0x99   : > { %v2918_v35 = vunpack.i.h.bf16 %v2916_v34  ;;  %v2917_v36 = vunpack.i.l.bf16 %v2916_v34  ;;  %1903 = vmatpush.bf16.msrb.mxu2 %v2769_v13  ;;  %v2766_v34 = vld [vmem:[%s3916_s3 + $0xa0] sm:$0xff] }
  0x9b   : > { %v366_v45 = vsel %vm358_vm3, %v3075_v4, %v2918_v35  ;;  %v365_v43 = vsel %vm358_vm3, %v3070_v63, %v2917_v36  ;;  %v2761_v4 = vld [vmem:[%s3916_s3 + $0x78] sm:$0xff]  ;;  %1949 = vmatpush.bf16.msrb.mxu1 %v2786_v18  ;;  %v2774_v35 = vld [vmem:[%s3916_s3 + $0xe0] sm:$0xff] }
  0x9c   : > { %v2921_v37 = vpop.permute.xlu1 %2920  ;;  %v2785_v63 = vld [vmem:[%s3916_s3 + $0x138] sm:$0xff]  ;;  %1890 = vmatpush.bf16.msra.mxu3 %v2761_v4 }
  0x9d   : > { %v2923_v38 = vunpack.i.h.bf16 %v2921_v37  ;;  %v2922_v39 = vunpack.i.l.bf16 %v2921_v37  ;;  %1929 = vmatpush.bf16.msrb.mxu0 %v2785_v63  ;;  %1904 = vmatpush.bf16.msrb.mxu2 %v2768_v15  ;;  %v2765_v4 = vld [vmem:[%s3916_s3 + $0x98] sm:$0xff] }
  0x9e   : > { %v2773_v63 = vld [vmem:[%s3916_s3 + $0xd8] sm:$0xff] }
  0x9f   : > { %v374_v40 = vsel %vm367_vm4, %v365_v43, %v2922_v39  ;;  %v375_v41 = vsel %vm367_vm4, %v366_v45, %v2923_v38  ;;  %1994 = vmatpush.bf16.msra.mxu1 %v2825_v17  ;;  %v2814_v38 = vld [vmem:[%s3916_s3 + $0x220] sm:$0xff] }
  0xa0   : > { %v379_v42 = vpack.c.bf16 %v375_v41, %v374_v40  ;;  %1891 = vmatpush.bf16.msra.mxu3 %v2760_v48  ;;  %v2822_v39 = vld [vmem:[%s3916_s3 + $0x260] sm:$0xff] }
  0xa1   : > { %1930 = vmatpush.bf16.msrb.mxu0 %v2784_v49  ;;  %1905 = vmatpush.bf16.msrb.mxu2 %v2767_v26 }
  0xa3   : > { %1995 = vmatpush.bf16.msra.mxu1 %v2824_v24 }
  0xa4   : > { %1892 = vmatpush.bf16.msra.mxu3 %v2759_v52  ;;  %v2764_v52 = vld [vmem:[%s3916_s3 + $0x90] sm:$0xff] }
  0xa5   : > { %1931 = vmatpush.bf16.msrb.mxu0 %v2783_v53  ;;  %1906 = vmatpush.bf16.msrb.mxu2 %v2766_v34  ;;  %v2772_v53 = vld [vmem:[%s3916_s3 + $0xd0] sm:$0xff] }
  0xa6   : > { %2210 = vmatmul.msk.bf16.gmra.mxu0 %vm476_vm5, %v377_v23  ;;  %2214 = vmatmul.msk.bf16.gmra.mxu1 %vm476_vm5, %v377_v23  ;;  %v2816_v23 = vld [vmem:[%s3916_s3 + $0x230] sm:$0xff] }
  0xa7   : > { %1996 = vmatpush.bf16.msra.mxu1 %v2823_v30 }
  0xa8   : > { %1893 = vmatpush.bf16.msra.mxu3 %v2758_v56 }
  0xa9   : > { %1932 = vmatpush.bf16.msrb.mxu0 %v2782_v57  ;;  %1907 = vmatpush.bf16.msrb.mxu2 %v2765_v4 }
  0xab   : > { %1997 = vmatpush.bf16.msra.mxu1 %v2822_v39 }
  0xac   : > { %1894 = vmatpush.bf16.msra.mxu3 %v2757_v60  ;;  %v2820_v60 = vld [vmem:[%s3916_s3 + $0x250] sm:$0xff] }
  0xad   : > { %1933 = vmatpush.bf16.msrb.mxu0 %v2781_v61  ;;  %1908 = vmatpush.bf16.msrb.mxu2 %v2764_v52 }
  0xaf   : > { %1998 = vmatpush.bf16.msra.mxu1 %v2821_v47 }
  0xb0   : > { %1895 = vmatpush.bf16.msra.mxu3 %v2756_v1 }
  0xb1   : > { %1934 = vmatpush.bf16.msrb.mxu0 %v2780_v2  ;;  %1909 = vmatpush.bf16.msrb.mxu2 %v2763_v5 }
  0xb3   : > { %1999 = vmatpush.bf16.msra.mxu1 %v2820_v60 }
  0xb4   : > { %1896 = vmatpush.bf16.msra.mxu3 %v2755_v6  ;;  %v2771_v6 = vld [vmem:[%s3916_s3 + $0xc8] sm:$0xff] }
  0xb5   : > { %1935 = vmatpush.bf16.msrb.mxu0 %v2779_v7  ;;  %v2811_v7 = vld [vmem:[%s3916_s3 + $0x208] sm:$0xff] }
  0xb6   : > { %2211 = vmatmul.msk.bf16.gmra.mxu0 %vm476_vm5, %v378_v33  ;;  %2215 = vmatmul.msk.bf16.gmra.mxu1 %vm476_vm5, %v378_v33 }
  0xb7   : > { %2000 = vmatpush.bf16.msra.mxu1 %v2819_v11 }
  0xb8   : > { %1897 = vmatpush.bf16.msra.mxu3 %v2754_v12 }
  0xb9   : > { %1936 = vmatpush.bf16.msrb.mxu0 %v2778_v16  ;;  %v2770_v16 = vld [vmem:[%s3916_s3 + $0xc0] sm:$0xff] }
  0xbc   : > { %1916 = vmatpush.bf16.msrb.mxu3 %v2777_v14  ;;  %v2762_v14 = vld [vmem:[%s3916_s3 + $0x80] sm:$0xff] }
  0xbd   : > { %1981 = vmatpush.bf16.msra.mxu0 %v2817_v19  ;;  %1910 = vmatpush.bf16.msrb.mxu2 %v2762_v14 }
  0xc0   : > { %1917 = vmatpush.bf16.msrb.mxu3 %v2776_v20 }
  0xc1   : > { %1982 = vmatpush.bf16.msra.mxu0 %v2816_v23  ;;  %v2818_v23 = vld [vmem:[%s3916_s3 + $0x240] sm:$0xff] }
  0xc2   : > { %2001 = vmatpush.bf16.msra.mxu1 %v2818_v23 }
  0xc4   : > { %1918 = vmatpush.bf16.msrb.mxu3 %v2775_v27 }
  0xc5   : > { %1983 = vmatpush.bf16.msra.mxu0 %v2815_v28 }
  0xc6   : > { %2212 = vmatmul.msk.bf16.gmra.mxu0 %vm476_vm5, %v379_v42  ;;  %2216 = vmatmul.msk.bf16.gmra.mxu1 %vm476_vm5, %v379_v42 }
  0xc8   : > { %1919 = vmatpush.bf16.msrb.mxu3 %v2774_v35 }
  0xc9   : > { %1984 = vmatpush.bf16.msra.mxu0 %v2814_v38 }
  0xcc   : > { %1920 = vmatpush.bf16.msrb.mxu3 %v2773_v63 }
  0xcd   : > { %1985 = vmatpush.bf16.msra.mxu0 %v2813_v46 }
  0xd0   : > { %1921 = vmatpush.bf16.msrb.mxu3 %v2772_v53 }
  0xd1   : > { %1986 = vmatpush.bf16.msra.mxu0 %v2812_v59 }
  0xd4   : > { %1922 = vmatpush.bf16.msrb.mxu3 %v2771_v6 }
  0xd5   : > { %1987 = vmatpush.bf16.msra.mxu0 %v2811_v7 }
  0xd8   : > { %1923 = vmatpush.bf16.msrb.mxu3 %v2770_v16 }
 0x113   : > { %v505_v9 = vpop.f32.mrf.mxu0  ;;  %v534_v10 = vpop.f32.mrf.mxu1 }
 0x114   : > { %v506_v45 = vadd.f32 %v505_v9, %v3311_v29  ;;  %v535_v43 = vadd.f32 %v534_v10, %v3313_v31 }
 0x116   : > { %v3349_v48 = vmax.f32 %v506_v45, 0.0  ;;  %v3351_v49 = vmax.f32 %v535_v43, 0.0 }
 0x118   : > { %v743_v61 = vrot.slane %v3349_v48, 5  ;;  %v757_v62 = vrot.slane %v3351_v49, 5  ;;  %v803_v0 = vrot.slane %v3349_v48, 7  ;;  %v653_v25 = vrot.slane %v3349_v48, 2 }
 0x119   : > { %v667_v26 = vrot.slane %v3351_v49, 2  ;;  %v623_v30 = vrot.slane %v3349_v48, 1  ;;  %v637_v34 = vrot.slane %v3351_v49, 1  ;;  %v713_v35 = vrot.slane %v3349_v48, 4 }
 0x11a   : > { %v817_v45 = vrot.slane %v3351_v49, 7 }
 0x11b   : > { %v507_v21 = vpop.f32.mrf.mxu0  ;;  %v536_v22 = vpop.f32.mrf.mxu1 }
 0x11c   : > { %v508_v32 = vadd.f32 %v507_v21, %v3311_v29  ;;  %v537_v33 = vadd.f32 %v536_v22, %v3313_v31  ;;  %v2810_v22 = vld [vmem:[%s3916_s3 + $0x200] sm:$0xff] }
 0x11d   : > { %1988 = vmatpush.bf16.msra.mxu0 %v2810_v22 }
 0x11e   : > { %v3333_v42 = vmax.f32 %v508_v32, 0.0  ;;  %v3335_v44 = vmax.f32 %v537_v33, 0.0 }
 0x120   : > { %v744_v54 = vrot.slane %v3333_v42, 4  ;;  %v758_v55 = vrot.slane %v3335_v44, 4  ;;  %v804_v56 = vrot.slane %v3333_v42, 6  ;;  %v586_v27 = vrot.slane %v3333_v42, 7 }
 0x121   : > { %v607_v28 = vrot.slane %v3335_v44, 7  ;;  %v654_v33 = vrot.slane %v3333_v42, 1  ;;  %v668_v43 = vrot.slane %v3335_v44, 1  ;;  %v728_v4 = vrot.slane %v3335_v44, 3 }
 0x122   : > { %v745_v8 = vsel %vm587_vm6, %v744_v54, %v743_v61  ;;  %v759_v9 = vsel %vm587_vm6, %v758_v55, %v757_v62  ;;  %v3390_v10 = vsel %vm587_vm6, %v804_v56, %v803_v0  ;;  %v588_v47 = vsel %vm587_vm6, %v586_v27, %v3349_v48 }
 0x123   : > { %v510_v36 = vpop.f32.mrf.mxu0  ;;  %v539_v37 = vpop.f32.mrf.mxu1  ;;  %v608_v52 = vsel %vm587_vm6, %v607_v28, %v3351_v49  ;;  %v638_v53 = vsel %vm587_vm6, %v3335_v44, %v637_v34  ;;  %v669_v0 = vsel %vm587_vm6, %v668_v43, %v667_v26 }
 0x124   : > { %v511_v40 = vadd.f32 %v510_v36, %v3311_v29  ;;  %v540_v41 = vadd.f32 %v539_v37, %v3313_v31  ;;  %v727_v36 = vrot.slane %v3351_v49, 4 }
 0x126   : > { %v3353_v50 = vmax.f32 %v511_v40, 0.0  ;;  %v3355_v51 = vmax.f32 %v540_v41, 0.0  ;;  %v624_v40 = vsel %vm587_vm6, %v3333_v42, %v623_v30  ;;  %v714_v41 = vrot.slane %v3333_v42, 3 }
 0x128   : > { %v746_v2 = vrot.slane %v3353_v50, 3  ;;  %v760_v3 = vrot.slane %v3355_v51, 3  ;;  %v806_v54 = vrot.slane %v3353_v50, 5  ;;  %v589_v55 = vrot.slane %v3353_v50, 6 }
 0x129   : > { %v609_v56 = vrot.slane %v3355_v51, 6  ;;  %v670_v11 = vsel %vm590_vm7, %v3355_v51, %v669_v0 }
 0x12a   : > { %v747_v12 = vsel %vm590_vm7, %v746_v2, %v745_v8  ;;  %v761_v13 = vsel %vm590_vm7, %v760_v3, %v759_v9  ;;  %v3455_v2 = vsel %vm587_vm6, %v714_v41, %v713_v35  ;;  %v3458_v3 = vsel %vm587_vm6, %v728_v4, %v727_v36 }
 0x12b   : > { %v512_v57 = vpop.f32.mrf.mxu0  ;;  %v541_v58 = vpop.f32.mrf.mxu1  ;;  %v807_v8 = vsel %vm590_vm7, %v806_v54, %v3390_v10  ;;  %v591_v9 = vsel %vm590_vm7, %v589_v55, %v588_v47  ;;  %v610_v16 = vsel %vm590_vm7, %v609_v56, %v608_v52 }
 0x12c   : > { %v513_v1 = vadd.f32 %v512_v57, %v3311_v29  ;;  %v542_v19 = vadd.f32 %v541_v58, %v3313_v31  ;;  %v655_v57 = vsel %vm587_vm6, %v654_v33, %v653_v25  ;;  %v625_v58 = vrot.slane %v3353_v50, 7 }
 0x12d   : > { %v656_v6 = vsel %vm590_vm7, %v3353_v50, %v655_v57 }
 0x12e   : > { %v3403_v18 = vmax.f32 %v513_v1, 0.0  ;;  %v3406_v20 = vmax.f32 %v542_v19, 0.0  ;;  %v639_v1 = vrot.slane %v3355_v51, 7  ;;  %v3475_v19 = vsel %vm590_vm7, %v625_v58, %v624_v40 }
 0x130   : > { %v748_v24 = vrot.slane %v3403_v18, 2  ;;  %v762_v39 = vrot.slane %v3406_v20, 2  ;;  %v592_v10 = vrot.slane %v3403_v18, 5  ;;  %v3482_v22 = vsel %vm590_vm7, %v639_v1, %v638_v53 }
 0x131   : > { %v671_v26 = vrot.slane %v3406_v20, 7  ;;  %v627_v27 = vrot.slane %v3403_v18, 6  ;;  %v808_v28 = vrot.slane %v3403_v18, 4  ;;  %v641_v33 = vrot.slane %v3406_v20, 6 }
 0x132   : > { %v749_v32 = vsel %vm593_vm8, %v748_v24, %v747_v12  ;;  %v763_v62 = vsel %vm593_vm8, %v762_v39, %v761_v13  ;;  %v716_v12 = vrot.slane %v3353_v50, 2  ;;  %v730_v13 = vrot.slane %v3355_v51, 2 }
 0x133   : > { %v515_v17 = vpop.f32.mrf.mxu0  ;;  %v544_v15 = vpop.f32.mrf.mxu1  ;;  %v718_v34 = vrot.slane %v3403_v18, 1  ;;  %v732_v36 = vrot.slane %v3406_v20, 1  ;;  %v594_v43 = vsel %vm593_vm8, %v592_v10, %v591_v9  ;;  %v809_v52 = vsel %vm593_vm8, %v808_v28, %v807_v8 }
 0x134   : > { %v516_v21 = vadd.f32 %v515_v17, %v3311_v29  ;;  %v545_v38 = vadd.f32 %v544_v15, %v3313_v31  ;;  %v611_v15 = vrot.slane %v3406_v20, 5  ;;  %v672_v58 = vsel %vm593_vm8, %v671_v26, %v670_v11 }
 0x136   : > { %v3426_v37 = vmax.f32 %v516_v21, 0.0  ;;  %v3447_v59 = vmax.f32 %v545_v38, 0.0  ;;  %v657_v21 = vrot.slane %v3403_v18, 7  ;;  %v612_v54 = vsel %vm593_vm8, %v611_v15, %v610_v16 }
 0x138   : > { %v750_v61 = vrot.slane %v3426_v37, 1  ;;  %v764_v17 = vrot.slane %v3447_v59, 1  ;;  %v595_v35 = vrot.slane %v3426_v37, 4  ;;  %v613_v40 = vrot.slane %v3447_v59, 4 }
 0x139   : > { %v659_v41 = vrot.slane %v3426_v37, 6  ;;  %v673_v4 = vrot.slane %v3447_v59, 6  ;;  %v658_v56 = vsel %vm593_vm8, %v657_v21, %v656_v6  ;;  %v810_v16 = vrot.slane %v3426_v37, 3 }
 0x13a   : > { %v751_v7 = vsel %vm596_vm9, %v750_v61, %v749_v32  ;;  %v765_v39 = vsel %vm596_vm9, %v764_v17, %v763_v62  ;;  %v597_v57 = vsel %vm596_vm9, %v595_v35, %v594_v43  ;;  %v643_v61 = vrot.slane %v3447_v59, 5 }
 0x13b   : > { %v517_v63 = vpop.f32.mrf.mxu0  ;;  %v546_v46 = vpop.f32.mrf.mxu1  ;;  %v614_v62 = vsel %vm596_vm9, %v613_v40, %v612_v54  ;;  %v660_v0 = vsel %vm596_vm9, %v659_v41, %v658_v56  ;;  %v674_v11 = vsel %vm596_vm9, %v673_v4, %v672_v58  ;;  %v811_v40 = vsel %vm596_vm9, %v810_v16, %v809_v52 }
 0x13c   : > { %v518_v60 = vadd.f32 %v517_v63, %v3311_v29  ;;  %v547_v5 = vadd.f32 %v546_v46, %v3313_v31  ;;  %v628_v16 = vsel %vm593_vm8, %v627_v27, %v3475_v19 }
 0x13e   : > { %v3471_v14 = vmax.f32 %v518_v60, 0.0  ;;  %v3484_v23 = vmax.f32 %v547_v5, 0.0  ;;  %v629_v60 = vrot.slane %v3426_v37, 5 }
 0x140   : > { %v752_v38 = vsel %vm599_vm10, %v3471_v14, %v751_v7  ;;  %v598_v46 = vrot.slane %v3471_v14, 3  ;;  %v766_v47 = vsel %vm599_vm10, %v3484_v23, %v765_v39  ;;  %v615_v55 = vrot.slane %v3484_v23, 3 }
 0x141   : > { %v661_v1 = vrot.slane %v3471_v14, 5  ;;  %v675_v5 = vrot.slane %v3484_v23, 5  ;;  %v645_v19 = vrot.slane %v3484_v23, 4 }
 0x142   : > { %v600_v6 = vsel %vm599_vm10, %v598_v46, %v597_v57  ;;  %v616_v15 = vsel %vm599_vm10, %v615_v55, %v614_v62 }
 0x143   : > { %v520_v24 = vpop.f32.mrf.mxu0  ;;  %v549_v25 = vpop.f32.mrf.mxu1 }
 0x144   : > { %v521_v30 = vadd.f32 %v520_v24, %v3311_v29  ;;  %v550_v32 = vadd.f32 %v549_v25, %v3313_v31 }
 0x146   : > { %v3502_v63 = vmax.f32 %v521_v30, 0.0  ;;  %v3508_v53 = vmax.f32 %v550_v32, 0.0 }
 0x148   : > { %v601_v9 = vrot.slane %v3502_v63, 2  ;;  %v617_v21 = vrot.slane %v3508_v53, 2  ;;  %v663_v24 = vrot.slane %v3502_v63, 4  ;;  %v677_v25 = vrot.slane %v3508_v53, 4 }
 0x149   : > { %v753_v26 = vrot.slane %v3502_v63, 7  ;;  %v767_v28 = vrot.slane %v3508_v53, 7 }
 0x14a   : > { %v603_v35 = vsel %vm602_vm11, %v601_v9, %v600_v6  ;;  %v618_v55 = vsel %vm602_vm11, %v617_v21, %v616_v15  ;;  %v2809_v6 = vld [vmem:[%s3916_s3 + $0x1f8] sm:$0xff]  ;;  %v731_v15 = vsel %vm590_vm7, %v730_v13, %v3458_v3  ;;  %v642_v21 = vsel %vm593_vm8, %v641_v33, %v3482_v22  ;;  %v2800_v33 = vld [vmem:[%s3916_s3 + $0x1b0] sm:$0xff] }
 0x14b   : > { %v522_v7 = vpop.f32.mrf.mxu0  ;;  %v551_v8 = vpop.f32.mrf.mxu1  ;;  %v754_v39 = vsel %vm602_vm11, %v753_v26, %v752_v38  ;;  %v768_v43 = vsel %vm602_vm11, %v767_v28, %v766_v47  ;;  %v812_v38 = vrot.slane %v3471_v14, 2  ;;  %v2849_v9 = vld [vmem:[%s3916_s3 + $0x338] sm:$0xff]  ;;  %v630_v3 = vsel %vm596_vm9, %v629_v60, %v628_v16  ;;  %v2848_v26 = vld [vmem:[%s3916_s3 + $0x330] sm:$0xff] }
 0x14c   : > { %v523_v17 = vadd.f32 %v522_v7, %v3311_v29  ;;  %v552_v10 = vadd.f32 %v551_v8, %v3313_v31  ;;  %v662_v29 = vsel %vm599_vm10, %v661_v1, %v660_v0  ;;  %v676_v31 = vsel %vm599_vm10, %v675_v5, %v674_v11  ;;  %v2801_v8 = vld [vmem:[%s3916_s3 + $0x1b8] sm:$0xff]  ;;  %v2856_v28 = vld [vmem:[%s3916_s3 + $0x370] sm:$0xff] }
 0x14d   : > { %v664_v56 = vsel %vm602_vm11, %v663_v24, %v662_v29  ;;  %v678_v57 = vsel %vm602_vm11, %v677_v25, %v676_v31  ;;  %v2857_v11 = vld [vmem:[%s3916_s3 + $0x378] sm:$0xff]  ;;  %v818_v22 = vrot.slane %v3335_v44, 6  ;;  %v813_v25 = vsel %vm599_vm10, %v812_v38, %v811_v40  ;;  %v2799_v38 = vld [vmem:[%s3916_s3 + $0x1a8] sm:$0xff] }
 0x14e   : > { %v3533_v30 = vmax.f32 %v523_v17, 0.0  ;;  %v3535_v32 = vmax.f32 %v552_v10, 0.0  ;;  %v631_v17 = vrot.slane %v3471_v14, 4  ;;  %v717_v10 = vsel %vm590_vm7, %v716_v12, %v3455_v2 }
 0x14f   : > { %v719_v27 = vsel %vm593_vm8, %v718_v34, %v717_v10  ;;  %v733_v2 = vsel %vm593_vm8, %v732_v36, %v731_v15  ;;  %v2808_v34 = vld [vmem:[%s3916_s3 + $0x1f0] sm:$0xff]  ;;  %v644_v36 = vsel %vm596_vm9, %v643_v61, %v642_v21  ;;  %v721_v61 = vrot.slane %v3471_v14, 7  ;;  %v2798_v21 = vld [vmem:[%s3916_s3 + $0x1a0] sm:$0xff] }
 0x150   : > { %v604_v41 = vrot.slane %v3533_v30, 1  ;;  %v619_v4 = vrot.slane %v3535_v32, 1  ;;  %v665_v46 = vrot.slane %v3533_v30, 3  ;;  %v679_v54 = vrot.slane %v3535_v32, 3 }
 0x151   : > { %v720_v12 = vsel %vm596_vm9, %v3426_v37, %v719_v27  ;;  %v734_v13 = vsel %vm596_vm9, %v3447_v59, %v733_v2  ;;  %v755_v60 = vrot.slane %v3533_v30, 6  ;;  %v769_v24 = vrot.slane %v3535_v32, 6 }
 0x152   : > { %v606_v47 = vsel %vm605_vm12, %v604_v41, %v603_v35  ;;  %v620_v52 = vsel %vm605_vm12, %v619_v4, %v618_v55  ;;  %v666_v58 = vsel %vm605_vm12, %v665_v46, %v664_v56  ;;  %v680_v62 = vsel %vm605_vm12, %v679_v54, %v678_v57 }
 0x153   : > { %v833_v0 = vpack.c.bf16 %v606_v47, %v606_v47  ;;  %v834_v1 = vpack.c.bf16 %v620_v52, %v620_v52  ;;  %v837_v5 = vpack.c.bf16 %v666_v58, %v666_v58  ;;  %v838_v7 = vpack.c.bf16 %v680_v62, %v680_v62  ;;  %v2847_v62 = vld [vmem:[%s3916_s3 + $0x328] sm:$0xff] }
 0x154   : > { %v632_v29 = vsel %vm599_vm10, %v631_v17, %v630_v3  ;;  %v735_v31 = vrot.slane %v3484_v23, 7  ;;  %v814_v35 = vrot.slane %v3502_v63, 1  ;;  %v633_v40 = vrot.slane %v3502_v63, 3 }
 0x155   : > { %1885 = vmatmul.bf16.vlgmr.msra.gmra.mxu2 %v833_v0  ;;  %1898 = vmatmul.bf16.vlgmr.msra.gmra.mxu3 %v834_v1  ;;  %v646_v41 = vsel %vm599_vm10, %v645_v19, %v644_v36  ;;  %v647_v4 = vrot.slane %v3508_v53, 3  ;;  %v3623_v46 = vsel %vm605_vm12, %v755_v60, %v754_v39  ;;  %v723_v54 = vrot.slane %v3502_v63, 6  ;;  %v2807_v39 = vld [vmem:[%s3916_s3 + $0x1e8] sm:$0xff]  ;;  %v2806_v19 = vld [vmem:[%s3916_s3 + $0x1e0] sm:$0xff] }
 0x156   : > { %1937 = vmatmul.bf16.vlgmr.msrb.gmra.mxu0 %v837_v5  ;;  %1950 = vmatmul.bf16.vlgmr.msrb.gmra.mxu1 %v838_v7  ;;  %v737_v55 = vrot.slane %v3508_v53, 6  ;;  %v3628_v56 = vsel %vm605_vm12, %v769_v24, %v768_v43  ;;  %v815_v57 = vsel %vm602_vm11, %v814_v35, %v813_v25  ;;  %v635_v47 = vrot.slane %v3533_v30, 2  ;;  %v2855_v0 = vld [vmem:[%s3916_s3 + $0x368] sm:$0xff]  ;;  %v2805_v35 = vld [vmem:[%s3916_s3 + $0x1d8] sm:$0xff] }
 0x157   : > { %1955 = vmatpush.bf16.msra.mxu2 %v2801_v8  ;;  %1968 = vmatpush.bf16.msra.mxu3 %v2809_v6  ;;  %v3640_v52 = vsel %vm605_vm12, %v3533_v30, %v815_v57  ;;  %v819_v43 = vsel %vm587_vm6, %v818_v22, %v817_v45  ;;  %v820_v58 = vrot.slane %v3355_v51, 5  ;;  %v649_v1 = vrot.slane %v3535_v32, 2  ;;  %v2853_v57 = vld [vmem:[%s3916_s3 + $0x358] sm:$0xff] }
 0x158   : > { %2033 = vmatpush.bf16.msrb.mxu0 %v2849_v9  ;;  %2046 = vmatpush.bf16.msrb.mxu1 %v2857_v11  ;;  %v822_v5 = vrot.slane %v3406_v20, 4  ;;  %v824_v7 = vrot.slane %v3447_v59, 3  ;;  %v826_v45 = vrot.slane %v3484_v23, 2  ;;  %v722_v8 = vsel %vm599_vm10, %v721_v61, %v720_v12  ;;  %v2846_v12 = vld [vmem:[%s3916_s3 + $0x320] sm:$0xff] }
 0x159   : > { %v725_v6 = vrot.slane %v3533_v30, 5  ;;  %v739_v9 = vrot.slane %v3535_v32, 5  ;;  %v821_v11 = vsel %vm590_vm7, %v820_v58, %v819_v43  ;;  %v634_v16 = vsel %vm602_vm11, %v633_v40, %v632_v29 }
 0x15a   : > { %v648_v17 = vsel %vm602_vm11, %v647_v4, %v646_v41  ;;  %v736_v10 = vsel %vm599_vm10, %v735_v31, %v734_v13  ;;  %v823_v15 = vsel %vm593_vm8, %v822_v5, %v821_v11  ;;  %v724_v27 = vsel %vm602_vm11, %v723_v54, %v722_v8  ;;  %v2854_v13 = vld [vmem:[%s3916_s3 + $0x360] sm:$0xff]  ;;  %v2797_v31 = vld [vmem:[%s3916_s3 + $0x198] sm:$0xff] }
 0x15b   : > { %1956 = vmatpush.bf16.msra.mxu2 %v2800_v33  ;;  %1969 = vmatpush.bf16.msra.mxu3 %v2808_v34  ;;  %v738_v2 = vsel %vm602_vm11, %v737_v55, %v736_v10  ;;  %v825_v3 = vsel %vm596_vm9, %v824_v7, %v823_v15  ;;  %v636_v22 = vsel %vm605_vm12, %v635_v47, %v634_v16  ;;  %v828_v24 = vrot.slane %v3508_v53, 1  ;;  %v2845_v55 = vld [vmem:[%s3916_s3 + $0x318] sm:$0xff] }
 0x15c   : > { %2034 = vmatpush.bf16.msrb.mxu0 %v2848_v26  ;;  %2047 = vmatpush.bf16.msrb.mxu1 %v2856_v28  ;;  %v650_v33 = vsel %vm605_vm12, %v649_v1, %v648_v17  ;;  %v827_v34 = vsel %vm599_vm10, %v826_v45, %v825_v3  ;;  %v726_v36 = vsel %vm605_vm12, %v725_v6, %v724_v27  ;;  %v683_v25 = vrot.slane %v3349_v48, 3  ;;  %v2804_v1 = vld [vmem:[%s3916_s3 + $0x1d0] sm:$0xff]  ;;  %v2803_v27 = vld [vmem:[%s3916_s3 + $0x1c8] sm:$0xff] }
 0x15d   : > { %v740_v60 = vsel %vm605_vm12, %v739_v9, %v738_v2  ;;  %v684_v26 = vrot.slane %v3333_v42, 2  ;;  %v698_v28 = vrot.slane %v3335_v44, 2  ;;  %v835_v29 = vpack.c.bf16 %v636_v22, %v636_v22  ;;  %v2851_v22 = vld [vmem:[%s3916_s3 + $0x348] sm:$0xff] }
 0x15e   : > { %v836_v61 = vpack.c.bf16 %v650_v33, %v650_v33  ;;  %v774_v40 = vrot.slane %v3333_v42, 5  ;;  %v829_v41 = vsel %vm602_vm11, %v828_v24, %v827_v34  ;;  %v841_v4 = vpack.c.bf16 %v726_v36, %v726_v36 }
 0x15f   : > { %1957 = vmatpush.bf16.msra.mxu2 %v2799_v38  ;;  %1970 = vmatpush.bf16.msra.mxu3 %v2807_v39  ;;  %v842_v54 = vpack.c.bf16 %v740_v60, %v740_v60  ;;  %v686_v38 = vrot.slane %v3353_v50, 1  ;;  %v788_v39 = vrot.slane %v3335_v44, 5  ;;  %v697_v42 = vrot.slane %v3351_v49, 3  ;;  %v2796_v44 = vld [vmem:[%s3916_s3 + $0x190] sm:$0xff] }
 0x160   : > { %2035 = vmatpush.bf16.msrb.mxu0 %v2847_v62  ;;  %2048 = vmatpush.bf16.msrb.mxu1 %v2855_v0  ;;  %v700_v47 = vrot.slane %v3355_v51, 1  ;;  %v776_v43 = vrot.slane %v3353_v50, 4  ;;  %v790_v58 = vrot.slane %v3355_v51, 4  ;;  %v773_v62 = vrot.slane %v3349_v48, 6  ;;  %v2844_v48 = vld [vmem:[%s3916_s3 + $0x310] sm:$0xff] }
 0x161   : > { %v787_v0 = vrot.slane %v3351_v49, 6  ;;  %v685_v50 = vsel %vm587_vm6, %v684_v26, %v683_v25  ;;  %v699_v51 = vsel %vm587_vm6, %v698_v28, %v697_v42  ;;  %v2852_v49 = vld [vmem:[%s3916_s3 + $0x350] sm:$0xff]  ;;  %v778_v45 = vrot.slane %v3403_v18, 3 }
 0x162   : > { %v687_v5 = vsel %vm590_vm7, %v686_v38, %v685_v50  ;;  %v775_v7 = vsel %vm587_vm6, %v774_v40, %v773_v62  ;;  %v701_v6 = vsel %vm590_vm7, %v700_v47, %v699_v51  ;;  %v3733_v16 = vsel %vm605_vm12, %v3535_v32, %v829_v41  ;;  %v2833_v41 = vld [vmem:[%s3916_s3 + $0x2b8] sm:$0xff]  ;;  %v2832_v50 = vld [vmem:[%s3916_s3 + $0x2b0] sm:$0xff] }
 0x163   : > { %1958 = vmatpush.bf16.msra.mxu2 %v2798_v21  ;;  %1971 = vmatpush.bf16.msra.mxu3 %v2806_v19  ;;  %v789_v8 = vsel %vm587_vm6, %v788_v39, %v787_v0  ;;  %v777_v9 = vsel %vm590_vm7, %v776_v43, %v775_v7  ;;  %v689_v17 = vrot.slane %v3426_v37, 7  ;;  %v703_v10 = vrot.slane %v3447_v59, 7  ;;  %v2795_v19 = vld [vmem:[%s3916_s3 + $0x188] sm:$0xff]  ;;  %v2838_v7 = vld [vmem:[%s3916_s3 + $0x2e0] sm:$0xff] }
 0x164   : > { %2036 = vmatpush.bf16.msrb.mxu0 %v2846_v12  ;;  %2049 = vmatpush.bf16.msrb.mxu1 %v2854_v13  ;;  %v791_v11 = vsel %vm590_vm7, %v790_v58, %v789_v8  ;;  %v780_v15 = vrot.slane %v3426_v37, 2  ;;  %v792_v21 = vrot.slane %v3406_v20, 3  ;;  %v688_v2 = vsel %vm593_vm8, %v3403_v18, %v687_v5  ;;  %v2843_v13 = vld [vmem:[%s3916_s3 + $0x308] sm:$0xff]  ;;  %v2830_v5 = vld [vmem:[%s3916_s3 + $0x2a0] sm:$0xff]  ;;  %v2837_v8 = vld [vmem:[%s3916_s3 + $0x2d8] sm:$0xff] }
 0x165   : > { %1911 = vmatmul.bf16.vlgmr.msrb.gmra.mxu2 %v835_v29  ;;  %1924 = vmatmul.bf16.vlgmr.msrb.gmra.mxu3 %v836_v61  ;;  %v691_v3 = vrot.slane %v3471_v14, 6  ;;  %v702_v37 = vsel %vm593_vm8, %v3406_v20, %v701_v6  ;;  %v705_v12 = vrot.slane %v3484_v23, 6  ;;  %v693_v33 = vrot.slane %v3502_v63, 5  ;;  %v2828_v6 = vld [vmem:[%s3916_s3 + $0x290] sm:$0xff] }
 0x166   : > { %1989 = vmatmul.bf16.vlgmr.msra.gmra.mxu0 %v841_v4  ;;  %2002 = vmatmul.bf16.vlgmr.msra.gmra.mxu1 %v842_v54  ;;  %v707_v18 = vrot.slane %v3508_v53, 5  ;;  %v779_v34 = vsel %vm593_vm8, %v778_v45, %v777_v9  ;;  %v794_v20 = vrot.slane %v3447_v59, 2  ;;  %v695_v36 = vrot.slane %v3533_v30, 4  ;;  %v2794_v59 = vld [vmem:[%s3916_s3 + $0x180] sm:$0xff]  ;;  %v2841_v4 = vld [vmem:[%s3916_s3 + $0x2f8] sm:$0xff]  ;;  %v2836_v9 = vld [vmem:[%s3916_s3 + $0x2d0] sm:$0xff] }
 0x167   : > { %1959 = vmatpush.bf16.msra.mxu2 %v2797_v31  ;;  %1972 = vmatpush.bf16.msra.mxu3 %v2805_v35  ;;  %v709_v60 = vrot.slane %v3535_v32, 4  ;;  %v782_v24 = vrot.slane %v3471_v14, 1  ;;  %v796_v25 = vrot.slane %v3484_v23, 1  ;;  %v690_v26 = vsel %vm596_vm9, %v689_v17, %v688_v2  ;;  %v2802_v14 = vld [vmem:[%s3916_s3 + $0x1c0] sm:$0xff]  ;;  %v2829_v45 = vld [vmem:[%s3916_s3 + $0x298] sm:$0xff]  ;;  %v2835_v17 = vld [vmem:[%s3916_s3 + $0x2c8] sm:$0xff] }
 0x168   : > { %2037 = vmatpush.bf16.msrb.mxu0 %v2845_v55  ;;  %2050 = vmatpush.bf16.msrb.mxu1 %v2853_v57  ;;  %v704_v28 = vsel %vm596_vm9, %v703_v10, %v702_v37  ;;  %v781_v29 = vsel %vm596_vm9, %v780_v15, %v779_v34  ;;  %v793_v61 = vsel %vm593_vm8, %v792_v21, %v791_v11  ;;  %v785_v35 = vrot.slane %v3533_v30, 7  ;;  %v2842_v30 = vld [vmem:[%s3916_s3 + $0x300] sm:$0xff]  ;;  %v2827_v11 = vld [vmem:[%s3916_s3 + $0x288] sm:$0xff]  ;;  %v2865_v21 = vld [vmem:[%s3916_s3 + $0x3b8] sm:$0xff] }
 0x169   : > { %v692_v23 = vsel %vm599_vm10, %v691_v3, %v690_v26  ;;  %v706_v31 = vsel %vm599_vm10, %v705_v12, %v704_v28  ;;  %v799_v40 = vrot.slane %v3535_v32, 7  ;;  %v795_v57 = vsel %vm596_vm9, %v794_v20, %v793_v61  ;;  %v2850_v32 = vld [vmem:[%s3916_s3 + $0x340] sm:$0xff]  ;;  %v2864_v3 = vld [vmem:[%s3916_s3 + $0x3b0] sm:$0xff]  ;;  %v2863_v12 = vld [vmem:[%s3916_s3 + $0x3a8] sm:$0xff] }
 0x16a   : > { %v694_v54 = vsel %vm602_vm11, %v693_v33, %v692_v23  ;;  %v708_v55 = vsel %vm602_vm11, %v707_v18, %v706_v31  ;;  %v783_v42 = vsel %vm599_vm10, %v782_v24, %v781_v29  ;;  %v797_v47 = vsel %vm599_vm10, %v796_v25, %v795_v57  ;;  %v2826_v10 = vld [vmem:[%s3916_s3 + $0x280] sm:$0xff]  ;;  %v2872_v37 = vld [vmem:[%s3916_s3 + $0x3f0] sm:$0xff]  ;;  %v2869_v33 = vld [vmem:[%s3916_s3 + $0x3d8] sm:$0xff] }
 0x16b   : > { %1960 = vmatpush.bf16.msra.mxu2 %v2796_v44  ;;  %1973 = vmatpush.bf16.msra.mxu3 %v2804_v1  ;;  %v696_v38 = vsel %vm605_vm12, %v695_v36, %v694_v54  ;;  %v710_v39 = vsel %vm605_vm12, %v709_v60, %v708_v55  ;;  %v784_v43 = vsel %vm602_vm11, %v3502_v63, %v783_v42  ;;  %v2840_v63 = vld [vmem:[%s3916_s3 + $0x2f0] sm:$0xff]  ;;  %v2834_v15 = vld [vmem:[%s3916_s3 + $0x2c0] sm:$0xff]  ;;  %v2859_v20 = vld [vmem:[%s3916_s3 + $0x388] sm:$0xff] }
 0x16c   : > { %2038 = vmatpush.bf16.msrb.mxu0 %v2844_v48  ;;  %2051 = vmatpush.bf16.msrb.mxu1 %v2852_v49  ;;  %v798_v58 = vsel %vm602_vm11, %v3508_v53, %v797_v47  ;;  %v786_v62 = vsel %vm605_vm12, %v785_v35, %v784_v43  ;;  %v839_v44 = vpack.c.bf16 %v696_v38, %v696_v38  ;;  %v2831_v48 = vld [vmem:[%s3916_s3 + $0x2a8] sm:$0xff]  ;;  %v2860_v18 = vld [vmem:[%s3916_s3 + $0x390] sm:$0xff]  ;;  %v2858_v60 = vld [vmem:[%s3916_s3 + $0x380] sm:$0xff] }
 0x16d   : > { %v800_v0 = vsel %vm605_vm12, %v799_v40, %v798_v58  ;;  %v840_v1 = vpack.c.bf16 %v710_v39, %v710_v39  ;;  %v845_v53 = vpack.c.bf16 %v786_v62, %v786_v62  ;;  %v2839_v49 = vld [vmem:[%s3916_s3 + $0x2e8] sm:$0xff]  ;;  %v844_v2 = vpack.c.bf16 %v3628_v56, %v3628_v56  ;;  %v2862_v56 = vld [vmem:[%s3916_s3 + $0x3a0] sm:$0xff]  ;;  %v2868_v34 = vld [vmem:[%s3916_s3 + $0x3d0] sm:$0xff] }
 0x16e   : > { %v846_v51 = vpack.c.bf16 %v800_v0, %v800_v0  ;;  %v2867_v36 = vld [vmem:[%s3916_s3 + $0x3c8] sm:$0xff]  ;;  %v2866_v24 = vld [vmem:[%s3916_s3 + $0x3c0] sm:$0xff]  ;;  %v847_v25 = vpack.c.bf16 %v3640_v52, %v3640_v52  ;;  %v848_v26 = vpack.c.bf16 %v3733_v16, %v3733_v16 }
 0x16f   : > { %1961 = vmatpush.bf16.msra.mxu2 %v2795_v19  ;;  %1974 = vmatpush.bf16.msra.mxu3 %v2803_v27  ;;  %v2873_v19 = vld [vmem:[%s3916_s3 + $0x3f8] sm:$0xff]  ;;  %v843_v27 = vpack.c.bf16 %v3623_v46, %v3623_v46  ;;  %v2871_v46 = vld [vmem:[%s3916_s3 + $0x3e8] sm:$0xff]  ;;  %v2924_v61 = vld [vmem:[%s3917_s4] ss:$0 sm:$0xff] }
 0x170   : > { %2039 = vmatpush.bf16.msrb.mxu0 %v2843_v13  ;;  %2052 = vmatpush.bf16.msrb.mxu1 %v2851_v22  ;;  %v2870_v13 = vld [vmem:[%s3916_s3 + $0x3e0] sm:$0xff]  ;;  %v2861_v22 = vld [vmem:[%s3916_s3 + $0x398] sm:$0xff] }
 0x173   : > { %1962 = vmatpush.bf16.msra.mxu2 %v2794_v59  ;;  %1975 = vmatpush.bf16.msra.mxu3 %v2802_v14 }
 0x174   : > { %2040 = vmatpush.bf16.msrb.mxu0 %v2842_v30  ;;  %2053 = vmatpush.bf16.msrb.mxu1 %v2850_v32 }
 0x176   : > { %1963 = vmatmul.bf16.vlgmr.msra.gmra.mxu2 %v839_v44  ;;  %1976 = vmatmul.bf16.vlgmr.msra.gmra.mxu3 %v840_v1 }
 0x177   : > { %2007 = vmatpush.bf16.msrb.mxu2 %v2833_v41  ;;  %2020 = vmatpush.bf16.msrb.mxu3 %v2841_v4 }
 0x178   : > { %2041 = vmatmul.bf16.vlgmr.msrb.gmra.mxu0 %v845_v53  ;;  %2054 = vmatmul.bf16.vlgmr.msrb.gmra.mxu1 %v846_v51 }
 0x17b   : > { %2008 = vmatpush.bf16.msrb.mxu2 %v2832_v50  ;;  %2021 = vmatpush.bf16.msrb.mxu3 %v2840_v63 }
 0x17f   : > { %2009 = vmatpush.bf16.msrb.mxu2 %v2831_v48  ;;  %2022 = vmatpush.bf16.msrb.mxu3 %v2839_v49 }
 0x183   : > { %2010 = vmatpush.bf16.msrb.mxu2 %v2830_v5  ;;  %2023 = vmatpush.bf16.msrb.mxu3 %v2838_v7 }
 0x187   : > { %2011 = vmatpush.bf16.msrb.mxu2 %v2829_v45  ;;  %2024 = vmatpush.bf16.msrb.mxu3 %v2837_v8 }
 0x18b   : > { %2012 = vmatpush.bf16.msrb.mxu2 %v2828_v6  ;;  %2025 = vmatpush.bf16.msrb.mxu3 %v2836_v9 }
 0x18f   : > { %2013 = vmatpush.bf16.msrb.mxu2 %v2827_v11  ;;  %2026 = vmatpush.bf16.msrb.mxu3 %v2835_v17 }
 0x193   : > { %2014 = vmatpush.bf16.msrb.mxu2 %v2826_v10  ;;  %2027 = vmatpush.bf16.msrb.mxu3 %v2834_v15 }
 0x196   : > { %2015 = vmatmul.bf16.vlgmr.msrb.gmra.mxu2 %v843_v27  ;;  %2028 = vmatmul.bf16.vlgmr.msrb.gmra.mxu3 %v844_v2  ;;  %v2085_v27 = vlaneseq }
 0x197   : > { %2059 = vmatpush.bf16.msra.mxu2 %v2865_v21  ;;  %2072 = vmatpush.bf16.msra.mxu3 %v2873_v19 }
 0x19b   : > { %2060 = vmatpush.bf16.msra.mxu2 %v2864_v3  ;;  %2073 = vmatpush.bf16.msra.mxu3 %v2872_v37  ;;  %v2086_v3 = vand.u32 127, %v2085_v27 }
 0x19d   : > { %vm2087_vm13 = vcmp.eq.s32.totalorder %v2086_v3, 65 }
 0x19f   : > { %2061 = vmatpush.bf16.msra.mxu2 %v2863_v12  ;;  %2074 = vmatpush.bf16.msra.mxu3 %v2871_v46 }
 0x1a3   : > { %2062 = vmatpush.bf16.msra.mxu2 %v2862_v56  ;;  %2075 = vmatpush.bf16.msra.mxu3 %v2870_v13 }
 0x1a7   : > { %2063 = vmatpush.bf16.msra.mxu2 %v2861_v22  ;;  %2076 = vmatpush.bf16.msra.mxu3 %v2869_v33 }
 0x1ab   : > { %2064 = vmatpush.bf16.msra.mxu2 %v2860_v18  ;;  %2077 = vmatpush.bf16.msra.mxu3 %v2868_v34 }
 0x1af   : > { %2065 = vmatpush.bf16.msra.mxu2 %v2859_v20  ;;  %2078 = vmatpush.bf16.msra.mxu3 %v2867_v36 }
 0x1b3   : > { %2066 = vmatpush.bf16.msra.mxu2 %v2858_v60  ;;  %2079 = vmatpush.bf16.msra.mxu3 %v2866_v24 }
 0x1b6   : > { %2067 = vmatmul.bf16.vlgmr.msra.gmra.mxu2 %v847_v25  ;;  %2080 = vmatmul.bf16.vlgmr.msra.gmra.mxu3 %v848_v26 }
 0x1d3   : > { %v1938_v28 = vpop.f32.mrf.mxu0  ;;  %v1951_v29 = vpop.f32.mrf.mxu1 }
 0x1d8   : > { %v1886_v59 = vpop.f32.mrf.mxu2  ;;  %v1899_v14 = vpop.f32.mrf.mxu3 }
 0x1d9   : > { %v1887_v23 = vadd.f32 %v2924_v61, %v1886_v59 }
 0x1db   : > { %v1900_v31 = vadd.f32 %v1899_v14, %v1887_v23  ;;  %v1940_v35 = vpop.f32.mrf.mxu0  ;;  %v1953_v40 = vpop.f32.mrf.mxu1 }
 0x1e0   : > { %v1888_v41 = vpop.f32.mrf.mxu2  ;;  %v1901_v4 = vpop.f32.mrf.mxu3 }
 0x1e3   : > { %v1990_v52 = vpop.f32.mrf.mxu0  ;;  %v2003_v54 = vpop.f32.mrf.mxu1 }
 0x1e8   : > { %v1912_v55 = vpop.f32.mrf.mxu2  ;;  %v1925_v16 = vpop.f32.mrf.mxu3 }
 0x1e9   : > { %v1913_v57 = vadd.f32 %v1912_v55, %v1900_v31 }
 0x1eb   : > { %v1926_v30 = vadd.f32 %v1925_v16, %v1913_v57  ;;  %v1992_v32 = vpop.f32.mrf.mxu0  ;;  %v2005_v38 = vpop.f32.mrf.mxu1 }
 0x1ed   : > { %v1939_v39 = vadd.f32 %v1938_v28, %v1926_v30 }
 0x1ef   : > { %v1952_v42 = vadd.f32 %v1951_v29, %v1939_v39 }
 0x1f0   : > { %v1914_v47 = vpop.f32.mrf.mxu2  ;;  %v1927_v43 = vpop.f32.mrf.mxu3 }
 0x1f5   : > { %v2042_v58 = vpop.f32.mrf.mxu0  ;;  %v2055_v62 = vpop.f32.mrf.mxu1 }
 0x1f9   : > { %v1964_v0 = vpop.f32.mrf.mxu2  ;;  %v1977_v44 = vpop.f32.mrf.mxu3 }
 0x1fa   : > { %v1965_v1 = vadd.f32 %v1964_v0, %v1952_v42 }
 0x1fc   : > { %v1978_v50 = vadd.f32 %v1977_v44, %v1965_v1 }
 0x1fd   : > { %v2044_v63 = vpop.f32.mrf.mxu0  ;;  %v2057_v53 = vpop.f32.mrf.mxu1 }
 0x1fe   : > { %v1991_v51 = vadd.f32 %v1990_v52, %v1978_v50 }
 0x200   : > { %v2004_v48 = vadd.f32 %v2003_v54, %v1991_v51 }
 0x201   : > { %v1966_v49 = vpop.f32.mrf.mxu2  ;;  %v1979_v5 = vpop.f32.mrf.mxu3 }
 0x219   : > { %v2016_v7 = vpop.f32.mrf.mxu2  ;;  %v2029_v45 = vpop.f32.mrf.mxu3 }
 0x21a   : > { %v2017_v9 = vadd.f32 %v2016_v7, %v2004_v48 }
 0x21c   : > { %v2030_v11 = vadd.f32 %v2029_v45, %v2017_v9 }
 0x21e   : > { %v2043_v17 = vadd.f32 %v2042_v58, %v2030_v11 }
 0x220   : > { %v2056_v10 = vadd.f32 %v2055_v62, %v2043_v17 }
 0x221   : > { %v2018_v8 = vpop.f32.mrf.mxu2  ;;  %v2031_v6 = vpop.f32.mrf.mxu3 }
 0x239   : > { %v2068_v15 = vpop.f32.mrf.mxu2  ;;  %v2081_v21 = vpop.f32.mrf.mxu3 }
 0x23a   : > { %v2069_v19 = vadd.f32 %v2068_v15, %v2056_v10 }
 0x23c   : > { %v2082_v2 = vadd.f32 %v2081_v21, %v2069_v19 }
 0x23e   : > { %2925 = vtanh.f32 %v2082_v2 }
 0x241   : > { %v2070_v37 = vpop.f32.mrf.mxu2  ;;  %v2083_v12 = vpop.f32.mrf.mxu3 }
 0x244   : > { %v2926_v46 = vpop.eup %2925 }
 0x245   : > { %v2089_v56 = vsel %vm2087_vm13, %v2926_v46, %v2082_v2 }
 0x246   : > { %2090 = vst [vmem:[%s227_s26] sm:$0xff] %v2089_v56 }
 0x247 PF: > { %s15_s18 = sadd.s32 1, %s2933_s18  }
 0x248   : > { %p12_p5 = scmp.ge.s32.totalorder %s15_s18, 4  }
 0x24a   :  { %14 = sbr.rel (!%p12_p5) target bundleno = 1 (0x1), region = 70 }

</bundles_post_ra>
